<compile_context>
chip_gen: v7x
topology: tpu7x:2x2x1
jax: 0.10.0
libtpu: 0.0.40
codegen_flags: <defaults>
</compile_context>

<pallas_src>
import random

import jax
import jax.numpy as jnp
from jax.experimental import pallas as pl
from jax.experimental.pallas import tpu as pltpu


# ----------------------------------------------------------------------------
# Helpers
# ----------------------------------------------------------------------------
def _round_up(x, m):
    return (x + m - 1) // m * m


def _pick_time_chunk(S, max_chunk=256):
    """Largest chunk of timesteps kept VMEM-resident per grid step."""
    if S <= max_chunk:
        return S
    for t in range(max_chunk, 7, -1):
        if S % t == 0 and t % 8 == 0:      # keep the (8, .) sublane tiling clean
            return t
    return S


def _pad_gates(w, num_gates, H, Hp):
    """Pad EACH gate block of the last dim from H to Hp lanes (zero fill)."""
    if Hp == H:
        return w
    lead = w.shape[:-1]
    w = w.reshape(*lead, num_gates, H)
    w = jnp.pad(w, [(0, 0)] * len(lead) + [(0, 0), (0, Hp - H)])
    return w.reshape(*lead, num_gates * Hp)


def _pad_rows(w, H, Hp):
    """Zero-pad the leading (contraction) dim from H to Hp rows."""
    if Hp == H:
        return w
    return jnp.pad(w, [(0, Hp - H)] + [(0, 0)] * (w.ndim - 1))


# ----------------------------------------------------------------------------
# Pallas kernels (one grid step == one chunk of T timesteps)
# ----------------------------------------------------------------------------
def _lstm_kernel(x_ref, wih_ref, whh_ref, b_ref, wout_ref, bout_ref,
                 o_ref, gx_sc, h_sc, c_sc):
    """LSTM, PyTorch gate order (i, f, g, o). b_ref = b_ih + b_hh (folded).

    Gate widths are per-gate padded to Hp lanes; padded lanes stay exactly 0
    (pad weights/biases are 0), so they never affect the real H columns.
    """
    c_idx = pl.program_id(1)
    Bb, T, _ = x_ref.shape
    Hp = h_sc.shape[1]                      # lane-padded hidden width

    @pl.when(c_idx == 0)
    def _():
        h_sc[...] = jnp.zeros_like(h_sc)
        c_sc[...] = jnp.zeros_like(c_sc)

    # ---- prologue (off the serial chain): hoisted input projection.
    # One [T, D] x [D, 4Hp] MXU matmul per batch row, stored time-major so the
    # recurrence below reads gx_sc[t] with a cheap leading-dim dynamic index.
    wih = wih_ref[...]
    bias = b_ref[...]                       # (1, 4Hp), hoisted out of the loop
    for b in range(Bb):                     # Bb is small and static
        gx_sc[:, b, :] = (
            jnp.dot(x_ref[b], wih, preferred_element_type=jnp.float32) + bias)

    # ---- serial recurrence: only h @ W_hh on the critical chain.
    whh = whh_ref[...]

    def step(t, carry):
        h, c = carry
        gates = gx_sc[t] + jnp.dot(h, whh, preferred_element_type=jnp.float32)
        i = jax.nn.sigmoid(gates[:, 0 * Hp:1 * Hp])   # vreg-aligned lane slices
        f = jax.nn.sigmoid(gates[:, 1 * Hp:2 * Hp])
        g = jnp.tanh(gates[:, 2 * Hp:3 * Hp])
        o = jax.nn.sigmoid(gates[:, 3 * Hp:4 * Hp])
        c = f * c + i * g
        h = o * jnp.tanh(c)
        return (h, c)

    h, c = jax.lax.fori_loop(0, T, step, (h_sc[...], c_sc[...]),
                             unroll=(T <= 32))
    h_sc[...] = h
    c_sc[...] = c

    @pl.when(c_idx == pl.num_programs(1) - 1)
    def _():
        # out[:, -1] followed by output_proj (Linear), fused here.
        y = (jnp.dot(h, wout_ref[...], preferred_element_type=jnp.float32)
             + bout_ref[...])
        o_ref[...] = y.astype(o_ref.dtype)


def _gru_kernel(x_ref, wih_ref, whh_ref, bih_ref, bhh_ref, wout_ref, bout_ref,
                o_ref, gx_sc, h_sc):
    """GRU, PyTorch gate order (r, z, n).  Gate widths per-gate padded to Hp."""
    c_idx = pl.program_id(1)
    Bb, T, _ = x_ref.shape
    Hp = h_sc.shape[1]

    @pl.when(c_idx == 0)
    def _():
        h_sc[...] = jnp.zeros_like(h_sc)

    # ---- prologue: hoisted x @ W_ih + b_ih (no recurrent dependency).
    wih = wih_ref[...]
    bih = bih_ref[...]
    for b in range(Bb):
        gx_sc[:, b, :] = (
            jnp.dot(x_ref[b], wih, preferred_element_type=jnp.float32) + bih)

    # ---- serial recurrence: only h @ W_hh (+ b_hh, needed inside r*(...)).
    whh = whh_ref[...]
    bhh = bhh_ref[...]

    def step(t, h):
        gi = gx_sc[t]
        gh = jnp.dot(h, whh, preferred_element_type=jnp.float32) + bhh
        r = jax.nn.sigmoid(gi[:, 0 * Hp:1 * Hp] + gh[:, 0 * Hp:1 * Hp])
        z = jax.nn.sigmoid(gi[:, 1 * Hp:2 * Hp] + gh[:, 1 * Hp:2 * Hp])
        n = jnp.tanh(gi[:, 2 * Hp:3 * Hp] + r * gh[:, 2 * Hp:3 * Hp])
        return (1.0 - z) * n + z * h

    h = jax.lax.fori_loop(0, T, step, h_sc[...], unroll=(T <= 32))
    h_sc[...] = h

    @pl.when(c_idx == pl.num_programs(1) - 1)
    def _():
        y = (jnp.dot(h, wout_ref[...], preferred_element_type=jnp.float32)
             + bout_ref[...])
        o_ref[...] = y.astype(o_ref.dtype)


# ----------------------------------------------------------------------------
# Wrapper around pallas_call
# ----------------------------------------------------------------------------
def _run_rnn_kernel(kernel, x, weights, Hp, out_dim, num_state):
    """x: [B, S, D_in] batch-first (as PyTorch). Returns [B, out_dim] f32."""
    B, S, D = x.shape
    T = _pick_time_chunk(S)
    # Split batch into blocks only when the blocks stay sublane-aligned; a
    # "parallel" batch axis lets v7x's two TensorCores each take half the batch.
    B_BLK = B // 2 if (B % 16 == 0) else B
    nb, nc = B // B_BLK, S // T
    Gp = weights[0].shape[1]                 # padded gate width (num_gates * Hp)

    in_specs = [pl.BlockSpec((B_BLK, T, D), lambda b, c: (b, c, 0))]
    for w in weights:                        # weights resident (constant index)
        assert w.ndim == 2
        in_specs.append(pl.BlockSpec(w.shape, lambda b, c: (0, 0)))

    grid_spec = pltpu.PrefetchScalarGridSpec(
        num_scalar_prefetch=0,
        grid=(nb, nc),
        in_specs=in_specs,
        out_specs=pl.BlockSpec((B_BLK, out_dim), lambda b, c: (b, 0)),
        scratch_shapes=(
            [pltpu.VMEM((T, B_BLK, Gp), jnp.float32)]               # time-major gates_x
            + [pltpu.VMEM((B_BLK, Hp), jnp.float32)] * num_state),  # h (, c)
    )
    return pl.pallas_call(
        kernel,
        out_shape=jax.ShapeDtypeStruct((B, out_dim), jnp.float32),
        grid_spec=grid_spec,
        compiler_params=pltpu.CompilerParams(
            dimension_semantics=("parallel", "arbitrary")),
    )(x, *weights)


def text_encoder_forward(x, params, op_idx=None):
    """Pallas equivalent of TextEncoder.forward.

    x: [B, S, input_dim] float32 (what nn.LSTM/nn.GRU(batch_first=True) expect).
    Returns: [B, 128] float32.
    """
    if op_idx is None:
        op_idx = random.randint(0, 1)

    H = params["hidden_dim"]
    Hp = _round_up(H, 128)                    # lane-aligned hidden width
    wout_p = _pad_rows(params["out_w"].T, H, Hp)   # [Hp, 128], pad rows zero
    bout = params["out_b"][None, :]                # [1, 128]

    if op_idx == 0:
        p = params["lstm"]
        weights = (
            _pad_gates(p["w_ih"].T, 4, H, Hp),                         # [D, 4Hp]
            _pad_rows(_pad_gates(p["w_hh"].T, 4, H, Hp), H, Hp),       # [Hp, 4Hp]
            _pad_gates(p["b_ih"] + p["b_hh"], 4, H, Hp)[None, :],      # [1, 4Hp]
            wout_p, bout,
        )
        return _run_rnn_kernel(_lstm_kernel, x, weights, Hp, 128, num_state=2)
    elif op_idx == 1:
        p = params["gru"]
        weights = (
            _pad_gates(p["w_ih"].T, 3, H, Hp),                         # [D, 3Hp]
            _pad_rows(_pad_gates(p["w_hh"].T, 3, H, Hp), H, Hp),       # [Hp, 3Hp]
            _pad_gates(p["b_ih"], 3, H, Hp)[None, :],                  # [1, 3Hp]
            _pad_gates(p["b_hh"], 3, H, Hp)[None, :],                  # [1, 3Hp]
            wout_p, bout,
        )
        return _run_rnn_kernel(_gru_kernel, x, weights, Hp, 128, num_state=1)
    else:
        # TODO(synk): op_idx == 2 (TransformerEncoder path) is not implemented;
        # the reference PyTorch module is itself shape-inconsistent there
        # (transformer emits d_model=input_dim but output_proj expects hidden_dim).
        raise NotImplementedError("TransformerEncoder branch (op_idx=2) not implemented")


# ----------------------------------------------------------------------------
# Deterministic parameter init (PyTorch-style uniform(-1/sqrt(fan), 1/sqrt(fan)))
# ----------------------------------------------------------------------------
def init_params(key, input_dim, hidden_dim):
    ks = jax.random.split(key, 12)
    k_rnn = 1.0 / jnp.sqrt(hidden_dim)

    def u(k, shape, bound):
        return jax.random.uniform(k, shape, jnp.float32, -bound, bound)

    lstm = dict(
        w_ih=u(ks[0], (4 * hidden_dim, input_dim), k_rnn),
        w_hh=u(ks[1], (4 * hidden_dim, hidden_dim), k_rnn),
        b_ih=u(ks[2], (4 * hidden_dim,), k_rnn),
        b_hh=u(ks[3], (4 * hidden_dim,), k_rnn),
    )
    gru = dict(
        w_ih=u(ks[4], (3 * hidden_dim, input_dim), k_rnn),
        w_hh=u(ks[5], (3 * hidden_dim, hidden_dim), k_rnn),
        b_ih=u(ks[6], (3 * hidden_dim,), k_rnn),
        b_hh=u(ks[7], (3 * hidden_dim,), k_rnn),
    )
    proj_in = hidden_dim if input_dim != hidden_dim else input_dim
    k_lin = 1.0 / jnp.sqrt(proj_in)
    out_w = u(ks[8], (128, proj_in), k_lin)
    out_b = u(ks[9], (128,), k_lin)
    return dict(hidden_dim=hidden_dim, lstm=lstm, gru=gru, out_w=out_w, out_b=out_b)


# ----------------------------------------------------------------------------
# Pure-JAX references for correctness checks
# ----------------------------------------------------------------------------
def _lstm_ref(x, p):
    H = p["w_hh"].shape[1]
    B = x.shape[0]

    def step(carry, xt):
        h, c = carry
        gates = xt @ p["w_ih"].T + p["b_ih"] + h @ p["w_hh"].T + p["b_hh"]
        i, f, g, o = jnp.split(gates, 4, axis=-1)
        c = jax.nn.sigmoid(f) * c + jax.nn.sigmoid(i) * jnp.tanh(g)
        h = jax.nn.sigmoid(o) * jnp.tanh(c)
        return (h, c), None

    (h, _), _ = jax.lax.scan(step, (jnp.zeros((B, H)), jnp.zeros((B, H))),
                             jnp.swapaxes(x, 0, 1))
    return h


def _gru_ref(x, p):
    H = p["w_hh"].shape[1]
    B = x.shape[0]

    def step(h, xt):
        gi = xt @ p["w_ih"].T + p["b_ih"]
        gh = h @ p["w_hh"].T + p["b_hh"]
        ir, iz, inn = jnp.split(gi, 3, axis=-1)
        hr, hz, hn = jnp.split(gh, 3, axis=-1)
        r = jax.nn.sigmoid(ir + hr)
        z = jax.nn.sigmoid(iz + hz)
        n = jnp.tanh(inn + r * hn)
        h = (1.0 - z) * n + z * h
        return h, None

    h, _ = jax.lax.scan(step, jnp.zeros((B, H)), jnp.swapaxes(x, 0, 1))
    return h


def _ref_forward(x, params, op_idx):
    h = _lstm_ref(x, params["lstm"]) if op_idx == 0 else _gru_ref(x, params["gru"])
    return h @ params["out_w"].T + params["out_b"]


# ----------------------------------------------------------------------------
if __name__ == "__main__":
    B, S, D_IN, H = 2, 8, 64, 32     # small shapes consistent with the module
    key = jax.random.PRNGKey(0)
    k_param, k_x = jax.random.split(key)
    params = init_params(k_param, D_IN, H)
    x = jax.random.normal(k_x, (B, S, D_IN), jnp.float32)

    for op_idx in (0, 1):            # 0 = LSTM branch, 1 = GRU branch
        y = text_encoder_forward(x, params, op_idx=op_idx)
        jax.block_until_ready(y)
        y_ref = _ref_forward(x, params, op_idx)
        assert y.shape == (B, 128), y.shape
        assert jnp.allclose(y, y_ref, atol=1e-4, rtol=1e-4), (
            f"mismatch on op_idx={op_idx}: max err "
            f"{jnp.max(jnp.abs(y - y_ref))}")

    print("KERNEL_OK")
</pallas_src>

<mosaic_0001>
module attributes {stable_mosaic.version = 11 : i64} {
  func.func @_lstm_kernel(%arg0: i32, %arg1: i32, %arg2: memref<2x8x64xf32, #tpu.memory_space<vmem>>, %arg3: memref<64x512xf32, #tpu.memory_space<vmem>>, %arg4: memref<128x512xf32, #tpu.memory_space<vmem>>, %arg5: memref<1x512xf32, #tpu.memory_space<vmem>>, %arg6: memref<128x128xf32, #tpu.memory_space<vmem>>, %arg7: memref<1x128xf32, #tpu.memory_space<vmem>>, %arg8: memref<2x128xf32, #tpu.memory_space<vmem>>, %arg9: memref<8x2x512xf32, #tpu.memory_space<vmem>>, %arg10: memref<2x128xf32, #tpu.memory_space<vmem>>, %arg11: memref<2x128xf32, #tpu.memory_space<vmem>>) attributes {dimension_semantics = [#tpu.dimension_semantics<parallel>, #tpu.dimension_semantics<arbitrary>], iteration_bounds = array<i64: 1, 1>, scalar_prefetch = 0 : i64, scratch_operands = 3 : i64, tpu.core_type = #tpu.core_type<tc>, window_params = [{transform_indices = @transform_0, window_bounds = array<i64: 2, 8, 64>}, {pipeline_mode = #tpu.pipeline_mode<synchronous>, transform_indices = @transform_1, window_bounds = array<i64: 64, 512>}, {pipeline_mode = #tpu.pipeline_mode<synchronous>, transform_indices = @transform_2, window_bounds = array<i64: 128, 512>}, {pipeline_mode = #tpu.pipeline_mode<synchronous>, transform_indices = @transform_3, window_bounds = array<i64: 1, 512>}, {pipeline_mode = #tpu.pipeline_mode<synchronous>, transform_indices = @transform_4, window_bounds = array<i64: 128, 128>}, {pipeline_mode = #tpu.pipeline_mode<synchronous>, transform_indices = @transform_5, window_bounds = array<i64: 1, 128>}, {transform_indices = @transform_6, window_bounds = array<i64: 2, 128>}]} {
    %c0_i32 = arith.constant 0 : i32
    %0 = arith.cmpi eq, %arg1, %c0_i32 : i32
    %1 = arith.extui %0 : i1 to i32
    %c0_i32_0 = arith.constant 0 : i32
    %2 = arith.cmpi ne, %1, %c0_i32_0 : i32
    scf.if %2 {
      %cst_77 = arith.constant 0.000000e+00 : f32
      %269 = vector.broadcast %cst_77 : f32 to vector<2x128xf32>
      %c0_78 = arith.constant 0 : index
      %c0_79 = arith.constant 0 : index
      %270 = vector.load %arg10[%c0_78, %c0_79] : memref<2x128xf32, #tpu.memory_space<vmem>>, vector<2x128xf32>
      tpu.vector_store %arg10[%c0_78, %c0_79], %269 {strides = array<i32>} : memref<2x128xf32, #tpu.memory_space<vmem>>, vector<2x128xf32>,
      %cst_80 = arith.constant 0.000000e+00 : f32
      %271 = vector.broadcast %cst_80 : f32 to vector<2x128xf32>
      %c0_81 = arith.constant 0 : index
      %c0_82 = arith.constant 0 : index
      %272 = vector.load %arg11[%c0_81, %c0_82] : memref<2x128xf32, #tpu.memory_space<vmem>>, vector<2x128xf32>
      tpu.vector_store %arg11[%c0_81, %c0_82], %271 {strides = array<i32>} : memref<2x128xf32, #tpu.memory_space<vmem>>, vector<2x128xf32>,
    } else {
    }
    %c0 = arith.constant 0 : index
    %c0_1 = arith.constant 0 : index
    %3 = vector.load %arg3[%c0, %c0_1] : memref<64x512xf32, #tpu.memory_space<vmem>>, vector<64x512xf32>
    %c0_2 = arith.constant 0 : index
    %c0_3 = arith.constant 0 : index
    %4 = vector.load %arg5[%c0_2, %c0_3] : memref<1x512xf32, #tpu.memory_space<vmem>>, vector<1x512xf32>
    %c0_4 = arith.constant 0 : index
    %c0_5 = arith.constant 0 : index
    %c0_6 = arith.constant 0 : index
    %5 = vector.load %arg2[%c0_4, %c0_5, %c0_6] : memref<2x8x64xf32, #tpu.memory_space<vmem>>, vector<1x8x64xf32>
    %6 = vector.shape_cast %5 : vector<1x8x64xf32> to vector<8x64xf32>
    %cst = arith.constant dense<0.000000e+00> : vector<8x512xf32>
    %7 = tpu.matmul %6, %3, %cst {dimension_numbers = #tpu.dot_dimension_numbers<[1], [0], [0], [1], [0, 0, 1, 1], [], []>} : vector<8x64xf32>, vector<64x512xf32>, vector<8x512xf32> -> vector<8x512xf32>
    %8 = vector.broadcast %4 : vector<1x512xf32> to vector<8x512xf32>
    %9 = arith.addf %7, %8 : vector<8x512xf32>
    %c0_7 = arith.constant 0 : index
    %c0_8 = arith.constant 0 : index
    %c0_9 = arith.constant 0 : index
    %10 = vector.load %arg9[%c0_7, %c0_8, %c0_9] : memref<8x2x512xf32, #tpu.memory_space<vmem>>, vector<8x1x512xf32>
    %11 = vector.shape_cast %10 : vector<8x1x512xf32> to vector<8x512xf32>
    %12 = vector.shape_cast %9 : vector<8x512xf32> to vector<8x1x512xf32>
    tpu.vector_store %arg9[%c0_7, %c0_8, %c0_9], %12 {strides = array<i32>} : memref<8x2x512xf32, #tpu.memory_space<vmem>>, vector<8x1x512xf32>,
    %c1 = arith.constant 1 : index
    %c0_10 = arith.constant 0 : index
    %c0_11 = arith.constant 0 : index
    %13 = vector.load %arg2[%c1, %c0_10, %c0_11] : memref<2x8x64xf32, #tpu.memory_space<vmem>>, vector<1x8x64xf32>
    %14 = vector.shape_cast %13 : vector<1x8x64xf32> to vector<8x64xf32>
    %cst_12 = arith.constant dense<0.000000e+00> : vector<8x512xf32>
    %15 = tpu.matmul %14, %3, %cst_12 {dimension_numbers = #tpu.dot_dimension_numbers<[1], [0], [0], [1], [0, 0, 1, 1], [], []>} : vector<8x64xf32>, vector<64x512xf32>, vector<8x512xf32> -> vector<8x512xf32>
    %16 = vector.broadcast %4 : vector<1x512xf32> to vector<8x512xf32>
    %17 = arith.addf %15, %16 : vector<8x512xf32>
    %c0_13 = arith.constant 0 : index
    %c1_14 = arith.constant 1 : index
    %c0_15 = arith.constant 0 : index
    %18 = vector.load %arg9[%c0_13, %c1_14, %c0_15] : memref<8x2x512xf32, #tpu.memory_space<vmem>>, vector<8x1x512xf32>
    %19 = vector.shape_cast %18 : vector<8x1x512xf32> to vector<8x512xf32>
    %20 = vector.shape_cast %17 : vector<8x512xf32> to vector<8x1x512xf32>
    tpu.vector_store %arg9[%c0_13, %c1_14, %c0_15], %20 {strides = array<i32>} : memref<8x2x512xf32, #tpu.memory_space<vmem>>, vector<8x1x512xf32>,
    %c0_16 = arith.constant 0 : index
    %c0_17 = arith.constant 0 : index
    %21 = vector.load %arg4[%c0_16, %c0_17] : memref<128x512xf32, #tpu.memory_space<vmem>>, vector<128x512xf32>
    %c0_18 = arith.constant 0 : index
    %c0_19 = arith.constant 0 : index
    %22 = vector.load %arg10[%c0_18, %c0_19] : memref<2x128xf32, #tpu.memory_space<vmem>>, vector<2x128xf32>
    %c0_20 = arith.constant 0 : index
    %c0_21 = arith.constant 0 : index
    %23 = vector.load %arg11[%c0_20, %c0_21] : memref<2x128xf32, #tpu.memory_space<vmem>>, vector<2x128xf32>
    %c0_i32_22 = arith.constant 0 : i32
    %24 = arith.index_cast %c0_i32_22 : i32 to index
    %c0_23 = arith.constant 0 : index
    %c0_24 = arith.constant 0 : index
    %25 = vector.load %arg9[%24, %c0_23, %c0_24] : memref<8x2x512xf32, #tpu.memory_space<vmem>>, vector<1x2x512xf32>
    %26 = vector.shape_cast %25 : vector<1x2x512xf32> to vector<2x512xf32>
    %cst_25 = arith.constant dense<0.000000e+00> : vector<2x512xf32>
    %27 = tpu.matmul %22, %21, %cst_25 {dimension_numbers = #tpu.dot_dimension_numbers<[1], [0], [0], [1], [0, 0, 1, 1], [], []>} : vector<2x128xf32>, vector<128x512xf32>, vector<2x512xf32> -> vector<2x512xf32>
    %28 = arith.addf %26, %27 : vector<2x512xf32>
    %29 = vector.extract_strided_slice %28 {offsets = [0, 0], sizes = [2, 128], strides = [1, 1]} : vector<2x512xf32> to vector<2x128xf32>
    %30 = arith.negf %29 : vector<2x128xf32>
    %31 = math.exp %30 : vector<2x128xf32>
    %cst_26 = arith.constant 1.000000e+00 : f32
    %32 = vector.broadcast %cst_26 : f32 to vector<2x128xf32>
    %33 = arith.addf %32, %31 : vector<2x128xf32>
    %34 = arith.divf %32, %33 : vector<2x128xf32>
    %35 = vector.extract_strided_slice %28 {offsets = [0, 128], sizes = [2, 128], strides = [1, 1]} : vector<2x512xf32> to vector<2x128xf32>
    %36 = arith.negf %35 : vector<2x128xf32>
    %37 = math.exp %36 : vector<2x128xf32>
    %cst_27 = arith.constant 1.000000e+00 : f32
    %38 = vector.broadcast %cst_27 : f32 to vector<2x128xf32>
    %39 = arith.addf %38, %37 : vector<2x128xf32>
    %40 = arith.divf %38, %39 : vector<2x128xf32>
    %41 = vector.extract_strided_slice %28 {offsets = [0, 256], sizes = [2, 128], strides = [1, 1]} : vector<2x512xf32> to vector<2x128xf32>
    %42 = math.tanh %41 : vector<2x128xf32>
    %43 = vector.extract_strided_slice %28 {offsets = [0, 384], sizes = [2, 128], strides = [1, 1]} : vector<2x512xf32> to vector<2x128xf32>
    %44 = arith.negf %43 : vector<2x128xf32>
    %45 = math.exp %44 : vector<2x128xf32>
    %cst_28 = arith.constant 1.000000e+00 : f32
    %46 = vector.broadcast %cst_28 : f32 to vector<2x128xf32>
    %47 = arith.addf %46, %45 : vector<2x128xf32>
    %48 = arith.divf %46, %47 : vector<2x128xf32>
    %49 = arith.mulf %40, %23 : vector<2x128xf32>
    %50 = arith.mulf %34, %42 : vector<2x128xf32>
    %51 = arith.addf %49, %50 : vector<2x128xf32>
    %52 = math.tanh %51 : vector<2x128xf32>
    %53 = arith.mulf %48, %52 : vector<2x128xf32>
    %c1_i32 = arith.constant 1 : i32
    %54 = arith.index_cast %c1_i32 : i32 to index
    %c0_29 = arith.constant 0 : index
    %c0_30 = arith.constant 0 : index
    %55 = vector.load %arg9[%54, %c0_29, %c0_30] : memref<8x2x512xf32, #tpu.memory_space<vmem>>, vector<1x2x512xf32>
    %56 = vector.shape_cast %55 : vector<1x2x512xf32> to vector<2x512xf32>
    %cst_31 = arith.constant dense<0.000000e+00> : vector<2x512xf32>
    %57 = tpu.matmul %53, %21, %cst_31 {dimension_numbers = #tpu.dot_dimension_numbers<[1], [0], [0], [1], [0, 0, 1, 1], [], []>} : vector<2x128xf32>, vector<128x512xf32>, vector<2x512xf32> -> vector<2x512xf32>
    %58 = arith.addf %56, %57 : vector<2x512xf32>
    %59 = vector.extract_strided_slice %58 {offsets = [0, 0], sizes = [2, 128], strides = [1, 1]} : vector<2x512xf32> to vector<2x128xf32>
    %60 = arith.negf %59 : vector<2x128xf32>
    %61 = math.exp %60 : vector<2x128xf32>
    %cst_32 = arith.constant 1.000000e+00 : f32
    %62 = vector.broadcast %cst_32 : f32 to vector<2x128xf32>
    %63 = arith.addf %62, %61 : vector<2x128xf32>
    %64 = arith.divf %62, %63 : vector<2x128xf32>
    %65 = vector.extract_strided_slice %58 {offsets = [0, 128], sizes = [2, 128], strides = [1, 1]} : vector<2x512xf32> to vector<2x128xf32>
    %66 = arith.negf %65 : vector<2x128xf32>
    %67 = math.exp %66 : vector<2x128xf32>
    %cst_33 = arith.constant 1.000000e+00 : f32
    %68 = vector.broadcast %cst_33 : f32 to vector<2x128xf32>
    %69 = arith.addf %68, %67 : vector<2x128xf32>
    %70 = arith.divf %68, %69 : vector<2x128xf32>
    %71 = vector.extract_strided_slice %58 {offsets = [0, 256], sizes = [2, 128], strides = [1, 1]} : vector<2x512xf32> to vector<2x128xf32>
    %72 = math.tanh %71 : vector<2x128xf32>
    %73 = vector.extract_strided_slice %58 {offsets = [0, 384], sizes = [2, 128], strides = [1, 1]} : vector<2x512xf32> to vector<2x128xf32>
    %74 = arith.negf %73 : vector<2x128xf32>
    %75 = math.exp %74 : vector<2x128xf32>
    %cst_34 = arith.constant 1.000000e+00 : f32
    %76 = vector.broadcast %cst_34 : f32 to vector<2x128xf32>
    %77 = arith.addf %76, %75 : vector<2x128xf32>
    %78 = arith.divf %76, %77 : vector<2x128xf32>
    %79 = arith.mulf %70, %51 : vector<2x128xf32>
    %80 = arith.mulf %64, %72 : vector<2x128xf32>
    %81 = arith.addf %79, %80 : vector<2x128xf32>
    %82 = math.tanh %81 : vector<2x128xf32>
    %83 = arith.mulf %78, %82 : vector<2x128xf32>
    %c2_i32 = arith.constant 2 : i32
    %84 = arith.index_cast %c2_i32 : i32 to index
    %c0_35 = arith.constant 0 : index
    %c0_36 = arith.constant 0 : index
    %85 = vector.load %arg9[%84, %c0_35, %c0_36] : memref<8x2x512xf32, #tpu.memory_space<vmem>>, vector<1x2x512xf32>
    %86 = vector.shape_cast %85 : vector<1x2x512xf32> to vector<2x512xf32>
    %cst_37 = arith.constant dense<0.000000e+00> : vector<2x512xf32>
    %87 = tpu.matmul %83, %21, %cst_37 {dimension_numbers = #tpu.dot_dimension_numbers<[1], [0], [0], [1], [0, 0, 1, 1], [], []>} : vector<2x128xf32>, vector<128x512xf32>, vector<2x512xf32> -> vector<2x512xf32>
    %88 = arith.addf %86, %87 : vector<2x512xf32>
    %89 = vector.extract_strided_slice %88 {offsets = [0, 0], sizes = [2, 128], strides = [1, 1]} : vector<2x512xf32> to vector<2x128xf32>
    %90 = arith.negf %89 : vector<2x128xf32>
    %91 = math.exp %90 : vector<2x128xf32>
    %cst_38 = arith.constant 1.000000e+00 : f32
    %92 = vector.broadcast %cst_38 : f32 to vector<2x128xf32>
    %93 = arith.addf %92, %91 : vector<2x128xf32>
    %94 = arith.divf %92, %93 : vector<2x128xf32>
    %95 = vector.extract_strided_slice %88 {offsets = [0, 128], sizes = [2, 128], strides = [1, 1]} : vector<2x512xf32> to vector<2x128xf32>
    %96 = arith.negf %95 : vector<2x128xf32>
    %97 = math.exp %96 : vector<2x128xf32>
    %cst_39 = arith.constant 1.000000e+00 : f32
    %98 = vector.broadcast %cst_39 : f32 to vector<2x128xf32>
    %99 = arith.addf %98, %97 : vector<2x128xf32>
    %100 = arith.divf %98, %99 : vector<2x128xf32>
    %101 = vector.extract_strided_slice %88 {offsets = [0, 256], sizes = [2, 128], strides = [1, 1]} : vector<2x512xf32> to vector<2x128xf32>
    %102 = math.tanh %101 : vector<2x128xf32>
    %103 = vector.extract_strided_slice %88 {offsets = [0, 384], sizes = [2, 128], strides = [1, 1]} : vector<2x512xf32> to vector<2x128xf32>
    %104 = arith.negf %103 : vector<2x128xf32>
    %105 = math.exp %104 : vector<2x128xf32>
    %cst_40 = arith.constant 1.000000e+00 : f32
    %106 = vector.broadcast %cst_40 : f32 to vector<2x128xf32>
    %107 = arith.addf %106, %105 : vector<2x128xf32>
    %108 = arith.divf %106, %107 : vector<2x128xf32>
    %109 = arith.mulf %100, %81 : vector<2x128xf32>
    %110 = arith.mulf %94, %102 : vector<2x128xf32>
    %111 = arith.addf %109, %110 : vector<2x128xf32>
    %112 = math.tanh %111 : vector<2x128xf32>
    %113 = arith.mulf %108, %112 : vector<2x128xf32>
    %c3_i32 = arith.constant 3 : i32
    %114 = arith.index_cast %c3_i32 : i32 to index
    %c0_41 = arith.constant 0 : index
    %c0_42 = arith.constant 0 : index
    %115 = vector.load %arg9[%114, %c0_41, %c0_42] : memref<8x2x512xf32, #tpu.memory_space<vmem>>, vector<1x2x512xf32>
    %116 = vector.shape_cast %115 : vector<1x2x512xf32> to vector<2x512xf32>
    %cst_43 = arith.constant dense<0.000000e+00> : vector<2x512xf32>
    %117 = tpu.matmul %113, %21, %cst_43 {dimension_numbers = #tpu.dot_dimension_numbers<[1], [0], [0], [1], [0, 0, 1, 1], [], []>} : vector<2x128xf32>, vector<128x512xf32>, vector<2x512xf32> -> vector<2x512xf32>
    %118 = arith.addf %116, %117 : vector<2x512xf32>
    %119 = vector.extract_strided_slice %118 {offsets = [0, 0], sizes = [2, 128], strides = [1, 1]} : vector<2x512xf32> to vector<2x128xf32>
    %120 = arith.negf %119 : vector<2x128xf32>
    %121 = math.exp %120 : vector<2x128xf32>
    %cst_44 = arith.constant 1.000000e+00 : f32
    %122 = vector.broadcast %cst_44 : f32 to vector<2x128xf32>
    %123 = arith.addf %122, %121 : vector<2x128xf32>
    %124 = arith.divf %122, %123 : vector<2x128xf32>
    %125 = vector.extract_strided_slice %118 {offsets = [0, 128], sizes = [2, 128], strides = [1, 1]} : vector<2x512xf32> to vector<2x128xf32>
    %126 = arith.negf %125 : vector<2x128xf32>
    %127 = math.exp %126 : vector<2x128xf32>
    %cst_45 = arith.constant 1.000000e+00 : f32
    %128 = vector.broadcast %cst_45 : f32 to vector<2x128xf32>
    %129 = arith.addf %128, %127 : vector<2x128xf32>
    %130 = arith.divf %128, %129 : vector<2x128xf32>
    %131 = vector.extract_strided_slice %118 {offsets = [0, 256], sizes = [2, 128], strides = [1, 1]} : vector<2x512xf32> to vector<2x128xf32>
    %132 = math.tanh %131 : vector<2x128xf32>
    %133 = vector.extract_strided_slice %118 {offsets = [0, 384], sizes = [2, 128], strides = [1, 1]} : vector<2x512xf32> to vector<2x128xf32>
    %134 = arith.negf %133 : vector<2x128xf32>
    %135 = math.exp %134 : vector<2x128xf32>
    %cst_46 = arith.constant 1.000000e+00 : f32
    %136 = vector.broadcast %cst_46 : f32 to vector<2x128xf32>
    %137 = arith.addf %136, %135 : vector<2x128xf32>
    %138 = arith.divf %136, %137 : vector<2x128xf32>
    %139 = arith.mulf %130, %111 : vector<2x128xf32>
    %140 = arith.mulf %124, %132 : vector<2x128xf32>
    %141 = arith.addf %139, %140 : vector<2x128xf32>
    %142 = math.tanh %141 : vector<2x128xf32>
    %143 = arith.mulf %138, %142 : vector<2x128xf32>
    %c4_i32 = arith.constant 4 : i32
    %144 = arith.index_cast %c4_i32 : i32 to index
    %c0_47 = arith.constant 0 : index
    %c0_48 = arith.constant 0 : index
    %145 = vector.load %arg9[%144, %c0_47, %c0_48] : memref<8x2x512xf32, #tpu.memory_space<vmem>>, vector<1x2x512xf32>
    %146 = vector.shape_cast %145 : vector<1x2x512xf32> to vector<2x512xf32>
    %cst_49 = arith.constant dense<0.000000e+00> : vector<2x512xf32>
    %147 = tpu.matmul %143, %21, %cst_49 {dimension_numbers = #tpu.dot_dimension_numbers<[1], [0], [0], [1], [0, 0, 1, 1], [], []>} : vector<2x128xf32>, vector<128x512xf32>, vector<2x512xf32> -> vector<2x512xf32>
    %148 = arith.addf %146, %147 : vector<2x512xf32>
    %149 = vector.extract_strided_slice %148 {offsets = [0, 0], sizes = [2, 128], strides = [1, 1]} : vector<2x512xf32> to vector<2x128xf32>
    %150 = arith.negf %149 : vector<2x128xf32>
    %151 = math.exp %150 : vector<2x128xf32>
    %cst_50 = arith.constant 1.000000e+00 : f32
    %152 = vector.broadcast %cst_50 : f32 to vector<2x128xf32>
    %153 = arith.addf %152, %151 : vector<2x128xf32>
    %154 = arith.divf %152, %153 : vector<2x128xf32>
    %155 = vector.extract_strided_slice %148 {offsets = [0, 128], sizes = [2, 128], strides = [1, 1]} : vector<2x512xf32> to vector<2x128xf32>
    %156 = arith.negf %155 : vector<2x128xf32>
    %157 = math.exp %156 : vector<2x128xf32>
    %cst_51 = arith.constant 1.000000e+00 : f32
    %158 = vector.broadcast %cst_51 : f32 to vector<2x128xf32>
    %159 = arith.addf %158, %157 : vector<2x128xf32>
    %160 = arith.divf %158, %159 : vector<2x128xf32>
    %161 = vector.extract_strided_slice %148 {offsets = [0, 256], sizes = [2, 128], strides = [1, 1]} : vector<2x512xf32> to vector<2x128xf32>
    %162 = math.tanh %161 : vector<2x128xf32>
    %163 = vector.extract_strided_slice %148 {offsets = [0, 384], sizes = [2, 128], strides = [1, 1]} : vector<2x512xf32> to vector<2x128xf32>
    %164 = arith.negf %163 : vector<2x128xf32>
    %165 = math.exp %164 : vector<2x128xf32>
    %cst_52 = arith.constant 1.000000e+00 : f32
    %166 = vector.broadcast %cst_52 : f32 to vector<2x128xf32>
    %167 = arith.addf %166, %165 : vector<2x128xf32>
    %168 = arith.divf %166, %167 : vector<2x128xf32>
    %169 = arith.mulf %160, %141 : vector<2x128xf32>
    %170 = arith.mulf %154, %162 : vector<2x128xf32>
    %171 = arith.addf %169, %170 : vector<2x128xf32>
    %172 = math.tanh %171 : vector<2x128xf32>
    %173 = arith.mulf %168, %172 : vector<2x128xf32>
    %c5_i32 = arith.constant 5 : i32
    %174 = arith.index_cast %c5_i32 : i32 to index
    %c0_53 = arith.constant 0 : index
    %c0_54 = arith.constant 0 : index
    %175 = vector.load %arg9[%174, %c0_53, %c0_54] : memref<8x2x512xf32, #tpu.memory_space<vmem>>, vector<1x2x512xf32>
    %176 = vector.shape_cast %175 : vector<1x2x512xf32> to vector<2x512xf32>
    %cst_55 = arith.constant dense<0.000000e+00> : vector<2x512xf32>
    %177 = tpu.matmul %173, %21, %cst_55 {dimension_numbers = #tpu.dot_dimension_numbers<[1], [0], [0], [1], [0, 0, 1, 1], [], []>} : vector<2x128xf32>, vector<128x512xf32>, vector<2x512xf32> -> vector<2x512xf32>
    %178 = arith.addf %176, %177 : vector<2x512xf32>
    %179 = vector.extract_strided_slice %178 {offsets = [0, 0], sizes = [2, 128], strides = [1, 1]} : vector<2x512xf32> to vector<2x128xf32>
    %180 = arith.negf %179 : vector<2x128xf32>
    %181 = math.exp %180 : vector<2x128xf32>
    %cst_56 = arith.constant 1.000000e+00 : f32
    %182 = vector.broadcast %cst_56 : f32 to vector<2x128xf32>
    %183 = arith.addf %182, %181 : vector<2x128xf32>
    %184 = arith.divf %182, %183 : vector<2x128xf32>
    %185 = vector.extract_strided_slice %178 {offsets = [0, 128], sizes = [2, 128], strides = [1, 1]} : vector<2x512xf32> to vector<2x128xf32>
    %186 = arith.negf %185 : vector<2x128xf32>
    %187 = math.exp %186 : vector<2x128xf32>
    %cst_57 = arith.constant 1.000000e+00 : f32
    %188 = vector.broadcast %cst_57 : f32 to vector<2x128xf32>
    %189 = arith.addf %188, %187 : vector<2x128xf32>
    %190 = arith.divf %188, %189 : vector<2x128xf32>
    %191 = vector.extract_strided_slice %178 {offsets = [0, 256], sizes = [2, 128], strides = [1, 1]} : vector<2x512xf32> to vector<2x128xf32>
    %192 = math.tanh %191 : vector<2x128xf32>
    %193 = vector.extract_strided_slice %178 {offsets = [0, 384], sizes = [2, 128], strides = [1, 1]} : vector<2x512xf32> to vector<2x128xf32>
    %194 = arith.negf %193 : vector<2x128xf32>
    %195 = math.exp %194 : vector<2x128xf32>
    %cst_58 = arith.constant 1.000000e+00 : f32
    %196 = vector.broadcast %cst_58 : f32 to vector<2x128xf32>
    %197 = arith.addf %196, %195 : vector<2x128xf32>
    %198 = arith.divf %196, %197 : vector<2x128xf32>
    %199 = arith.mulf %190, %171 : vector<2x128xf32>
    %200 = arith.mulf %184, %192 : vector<2x128xf32>
    %201 = arith.addf %199, %200 : vector<2x128xf32>
    %202 = math.tanh %201 : vector<2x128xf32>
    %203 = arith.mulf %198, %202 : vector<2x128xf32>
    %c6_i32 = arith.constant 6 : i32
    %204 = arith.index_cast %c6_i32 : i32 to index
    %c0_59 = arith.constant 0 : index
    %c0_60 = arith.constant 0 : index
    %205 = vector.load %arg9[%204, %c0_59, %c0_60] : memref<8x2x512xf32, #tpu.memory_space<vmem>>, vector<1x2x512xf32>
    %206 = vector.shape_cast %205 : vector<1x2x512xf32> to vector<2x512xf32>
    %cst_61 = arith.constant dense<0.000000e+00> : vector<2x512xf32>
    %207 = tpu.matmul %203, %21, %cst_61 {dimension_numbers = #tpu.dot_dimension_numbers<[1], [0], [0], [1], [0, 0, 1, 1], [], []>} : vector<2x128xf32>, vector<128x512xf32>, vector<2x512xf32> -> vector<2x512xf32>
    %208 = arith.addf %206, %207 : vector<2x512xf32>
    %209 = vector.extract_strided_slice %208 {offsets = [0, 0], sizes = [2, 128], strides = [1, 1]} : vector<2x512xf32> to vector<2x128xf32>
    %210 = arith.negf %209 : vector<2x128xf32>
    %211 = math.exp %210 : vector<2x128xf32>
    %cst_62 = arith.constant 1.000000e+00 : f32
    %212 = vector.broadcast %cst_62 : f32 to vector<2x128xf32>
    %213 = arith.addf %212, %211 : vector<2x128xf32>
    %214 = arith.divf %212, %213 : vector<2x128xf32>
    %215 = vector.extract_strided_slice %208 {offsets = [0, 128], sizes = [2, 128], strides = [1, 1]} : vector<2x512xf32> to vector<2x128xf32>
    %216 = arith.negf %215 : vector<2x128xf32>
    %217 = math.exp %216 : vector<2x128xf32>
    %cst_63 = arith.constant 1.000000e+00 : f32
    %218 = vector.broadcast %cst_63 : f32 to vector<2x128xf32>
    %219 = arith.addf %218, %217 : vector<2x128xf32>
    %220 = arith.divf %218, %219 : vector<2x128xf32>
    %221 = vector.extract_strided_slice %208 {offsets = [0, 256], sizes = [2, 128], strides = [1, 1]} : vector<2x512xf32> to vector<2x128xf32>
    %222 = math.tanh %221 : vector<2x128xf32>
    %223 = vector.extract_strided_slice %208 {offsets = [0, 384], sizes = [2, 128], strides = [1, 1]} : vector<2x512xf32> to vector<2x128xf32>
    %224 = arith.negf %223 : vector<2x128xf32>
    %225 = math.exp %224 : vector<2x128xf32>
    %cst_64 = arith.constant 1.000000e+00 : f32
    %226 = vector.broadcast %cst_64 : f32 to vector<2x128xf32>
    %227 = arith.addf %226, %225 : vector<2x128xf32>
    %228 = arith.divf %226, %227 : vector<2x128xf32>
    %229 = arith.mulf %220, %201 : vector<2x128xf32>
    %230 = arith.mulf %214, %222 : vector<2x128xf32>
    %231 = arith.addf %229, %230 : vector<2x128xf32>
    %232 = math.tanh %231 : vector<2x128xf32>
    %233 = arith.mulf %228, %232 : vector<2x128xf32>
    %c7_i32 = arith.constant 7 : i32
    %234 = arith.index_cast %c7_i32 : i32 to index
    %c0_65 = arith.constant 0 : index
    %c0_66 = arith.constant 0 : index
    %235 = vector.load %arg9[%234, %c0_65, %c0_66] : memref<8x2x512xf32, #tpu.memory_space<vmem>>, vector<1x2x512xf32>
    %236 = vector.shape_cast %235 : vector<1x2x512xf32> to vector<2x512xf32>
    %cst_67 = arith.constant dense<0.000000e+00> : vector<2x512xf32>
    %237 = tpu.matmul %233, %21, %cst_67 {dimension_numbers = #tpu.dot_dimension_numbers<[1], [0], [0], [1], [0, 0, 1, 1], [], []>} : vector<2x128xf32>, vector<128x512xf32>, vector<2x512xf32> -> vector<2x512xf32>
    %238 = arith.addf %236, %237 : vector<2x512xf32>
    %239 = vector.extract_strided_slice %238 {offsets = [0, 0], sizes = [2, 128], strides = [1, 1]} : vector<2x512xf32> to vector<2x128xf32>
    %240 = arith.negf %239 : vector<2x128xf32>
    %241 = math.exp %240 : vector<2x128xf32>
    %cst_68 = arith.constant 1.000000e+00 : f32
    %242 = vector.broadcast %cst_68 : f32 to vector<2x128xf32>
    %243 = arith.addf %242, %241 : vector<2x128xf32>
    %244 = arith.divf %242, %243 : vector<2x128xf32>
    %245 = vector.extract_strided_slice %238 {offsets = [0, 128], sizes = [2, 128], strides = [1, 1]} : vector<2x512xf32> to vector<2x128xf32>
    %246 = arith.negf %245 : vector<2x128xf32>
    %247 = math.exp %246 : vector<2x128xf32>
    %cst_69 = arith.constant 1.000000e+00 : f32
    %248 = vector.broadcast %cst_69 : f32 to vector<2x128xf32>
    %249 = arith.addf %248, %247 : vector<2x128xf32>
    %250 = arith.divf %248, %249 : vector<2x128xf32>
    %251 = vector.extract_strided_slice %238 {offsets = [0, 256], sizes = [2, 128], strides = [1, 1]} : vector<2x512xf32> to vector<2x128xf32>
    %252 = math.tanh %251 : vector<2x128xf32>
    %253 = vector.extract_strided_slice %238 {offsets = [0, 384], sizes = [2, 128], strides = [1, 1]} : vector<2x512xf32> to vector<2x128xf32>
    %254 = arith.negf %253 : vector<2x128xf32>
    %255 = math.exp %254 : vector<2x128xf32>
    %cst_70 = arith.constant 1.000000e+00 : f32
    %256 = vector.broadcast %cst_70 : f32 to vector<2x128xf32>
    %257 = arith.addf %256, %255 : vector<2x128xf32>
    %258 = arith.divf %256, %257 : vector<2x128xf32>
    %259 = arith.mulf %250, %231 : vector<2x128xf32>
    %260 = arith.mulf %244, %252 : vector<2x128xf32>
    %261 = arith.addf %259, %260 : vector<2x128xf32>
    %262 = math.tanh %261 : vector<2x128xf32>
    %263 = arith.mulf %258, %262 : vector<2x128xf32>
    %c8_i32 = arith.constant 8 : i32
    %c0_71 = arith.constant 0 : index
    %c0_72 = arith.constant 0 : index
    %264 = vector.load %arg10[%c0_71, %c0_72] : memref<2x128xf32, #tpu.memory_space<vmem>>, vector<2x128xf32>
    tpu.vector_store %arg10[%c0_71, %c0_72], %263 {strides = array<i32>} : memref<2x128xf32, #tpu.memory_space<vmem>>, vector<2x128xf32>,
    %c0_73 = arith.constant 0 : index
    %c0_74 = arith.constant 0 : index
    %265 = vector.load %arg11[%c0_73, %c0_74] : memref<2x128xf32, #tpu.memory_space<vmem>>, vector<2x128xf32>
    tpu.vector_store %arg11[%c0_73, %c0_74], %261 {strides = array<i32>} : memref<2x128xf32, #tpu.memory_space<vmem>>, vector<2x128xf32>,
    %c0_i32_75 = arith.constant 0 : i32
    %266 = arith.cmpi eq, %arg1, %c0_i32_75 : i32
    %267 = arith.extui %266 : i1 to i32
    %c0_i32_76 = arith.constant 0 : i32
    %268 = arith.cmpi ne, %267, %c0_i32_76 : i32
    scf.if %268 {
      %c0_77 = arith.constant 0 : index
      %c0_78 = arith.constant 0 : index
      %269 = vector.load %arg6[%c0_77, %c0_78] : memref<128x128xf32, #tpu.memory_space<vmem>>, vector<128x128xf32>
      %cst_79 = arith.constant dense<0.000000e+00> : vector<2x128xf32>
      %270 = tpu.matmul %263, %269, %cst_79 {dimension_numbers = #tpu.dot_dimension_numbers<[1], [0], [0], [1], [0, 0, 1, 1], [], []>} : vector<2x128xf32>, vector<128x128xf32>, vector<2x128xf32> -> vector<2x128xf32>
      %c0_80 = arith.constant 0 : index
      %c0_81 = arith.constant 0 : index
      %271 = vector.load %arg7[%c0_80, %c0_81] : memref<1x128xf32, #tpu.memory_space<vmem>>, vector<1x128xf32>
      %272 = vector.broadcast %271 : vector<1x128xf32> to vector<2x128xf32>
      %273 = arith.addf %270, %272 : vector<2x128xf32>
      %c0_82 = arith.constant 0 : index
      %c0_83 = arith.constant 0 : index
      %274 = vector.load %arg8[%c0_82, %c0_83] : memref<2x128xf32, #tpu.memory_space<vmem>>, vector<2x128xf32>
      tpu.vector_store %arg8[%c0_82, %c0_83], %273 {strides = array<i32>} : memref<2x128xf32, #tpu.memory_space<vmem>>, vector<2x128xf32>,
    } else {
    }
    return
  }
  func.func @transform_0(%arg0: i32, %arg1: i32) -> (i32, i32, i32) {
    %c0_i32 = arith.constant 0 : i32
    %c0_i32_0 = arith.constant 0 : i32
    return %arg0, %arg1, %c0_i32 : i32, i32, i32
  }
  func.func @transform_1(%arg0: i32, %arg1: i32) -> (i32, i32) {
    %c0_i32 = arith.constant 0 : i32
    %c0_i32_0 = arith.constant 0 : i32
    %c0_i32_1 = arith.constant 0 : i32
    return %c0_i32, %c0_i32_0 : i32, i32
  }
  func.func @transform_2(%arg0: i32, %arg1: i32) -> (i32, i32) {
    %c0_i32 = arith.constant 0 : i32
    %c0_i32_0 = arith.constant 0 : i32
    %c0_i32_1 = arith.constant 0 : i32
    return %c0_i32, %c0_i32_0 : i32, i32
  }
  func.func @transform_3(%arg0: i32, %arg1: i32) -> (i32, i32) {
    %c0_i32 = arith.constant 0 : i32
    %c0_i32_0 = arith.constant 0 : i32
    %c0_i32_1 = arith.constant 0 : i32
    return %c0_i32, %c0_i32_0 : i32, i32
  }
  func.func @transform_4(%arg0: i32, %arg1: i32) -> (i32, i32) {
    %c0_i32 = arith.constant 0 : i32
    %c0_i32_0 = arith.constant 0 : i32
    %c0_i32_1 = arith.constant 0 : i32
    return %c0_i32, %c0_i32_0 : i32, i32
  }
  func.func @transform_5(%arg0: i32, %arg1: i32) -> (i32, i32) {
    %c0_i32 = arith.constant 0 : i32
    %c0_i32_0 = arith.constant 0 : i32
    %c0_i32_1 = arith.constant 0 : i32
    return %c0_i32, %c0_i32_0 : i32, i32
  }
  func.func @transform_6(%arg0: i32, %arg1: i32) -> (i32, i32) {
    %c0_i32 = arith.constant 0 : i32
    %c0_i32_0 = arith.constant 0 : i32
    return %arg0, %c0_i32 : i32, i32
  }
}

</mosaic_0001>

<bundles_post_ra>
// kernel: tpu_custom_call.1
= control target key start
LH: loop header
LB: loop body
LE: loop exit
PB: predicated region body
PF: predicated region fallthrough
CT: control target
= control target key end

     0   :  { %11 = vsyncpa [#allocation6], 0  ;;  %s3933_s0 = inlined_call_operand.hbm [shape: f32[2,8,64], index: 0, kind: input, shape index: {}]   ;;  %s3934_s1 = inlined_call_operand.hbm [shape: f32[64,512], index: 1, kind: input, shape index: {}]   ;;  %s3935_s2 = inlined_call_operand.hbm [shape: f32[128,512], index: 2, kind: input, shape index: {}]   ;;  %s3936_s3 = inlined_call_operand.vmem [shape: f32[1,512], index: 3, kind: input, shape index: {}]   ;;  %s3937_s4 = inlined_call_operand.hbm [shape: f32[128,128], index: 4, kind: input, shape index: {}]   ;;  %s3938_s5 = inlined_call_operand.vmem [shape: f32[1,128], index: 5, kind: input, shape index: {}]   ;;  %s3939_s6 = inlined_call_operand.hbm [shape: f32[2,128], index: 6, kind: output, shape index: {}]  }
   0x1   :  { %12 = vsyncpa [#allocation9], 0 }
   0x2   :  { %13 = vsyncpa [#allocation12], 0 }
   0x3   :  { %14 = vsyncpa [#allocation7], 0  ;;  %s3334_s21 = smov [#allocation8]   ;;  %s3216_s25 = scalar_lea.hbm %s3934_s1, 4096 }
   0x4   :  { %s32_s22 = sshll.u32 %s3334_s21, 4  ;;  %p3217_p0 = scmp.ne.s32.totalorder %s3934_s1, %s3216_s25  ;;  %s33_s22 = int_to_ptr.vmem [resolvable:$true] %s32_s22 }
   0x5   :  { %p3220_p1 = scmp.lt.u32.totalorder %s3216_s25, %s3934_s1 }
   0x7   :  { %p3222_p2 = pnand %p3220_p1, %p3217_p0 }
   0x9   :  { %3225 = shalt.err (!%p3222_p2)
}
   0xa   :  { %s3226_s30 = scalar_lea.vmem %s33_s22, 4096  ;;  %p3231_p4 = scmp.lt.s32.totalorder %s33_s22, %s33_s22 }
   0xb   :  { %p3227_p3 = scmp.ne.s32.totalorder %s33_s22, %s3226_s30  ;;  %p3232_p5 = scmp.lt.s32.totalorder %s3226_s30, %s3226_s30 }
   0xd   :  { %p3233_p6 = por %p3232_p5, %p3231_p4 }
   0xf   :  { %p3234_p7 = pnand %p3233_p6, %p3227_p3 }
  0x11   :  { %3237 = shalt.err (!%p3234_p7)
}
  0x12   :  { %s3335_s7 = smov 512   ;;  %s3336_s8 = smov 32  }
  0x13   :  { %38 = dma.hbm_to_vmem [thread:$0]  %s3934_s1, 4096, %s33_s22, [#allocation9], %s3335_s7, %s3335_s7, %s3336_s8  }
  0x14   :  { %s3337_s11 = smov [#allocation5]   ;;  %s3238_s15 = scalar_lea.hbm %s3933_s0, 256 }
  0x15   :  { %s20_s12 = sshll.u32 %s3337_s11, 4  ;;  %p3239_p8 = scmp.ne.s32.totalorder %s3933_s0, %s3238_s15  ;;  %s21_s12 = int_to_ptr.vmem [resolvable:$true] %s20_s12 }
  0x16   :  { %p3242_p9 = scmp.lt.u32.totalorder %s3238_s15, %s3933_s0 }
  0x18   :  { %p3244_p10 = pnand %p3242_p9, %p3239_p8 }
  0x1a   :  { %3247 = shalt.err (!%p3244_p10)
}
  0x1b   :  { %s3248_s20 = scalar_lea.vmem %s21_s12, 256  ;;  %p3253_p12 = scmp.lt.s32.totalorder %s21_s12, %s21_s12 }
  0x1c   :  { %p3249_p11 = scmp.ne.s32.totalorder %s21_s12, %s3248_s20  ;;  %p3254_p13 = scmp.lt.s32.totalorder %s3248_s20, %s3248_s20 }
  0x1e   :  { %p3255_p0 = por %p3254_p13, %p3253_p12 }
  0x20   :  { %p3256_p1 = pnand %p3255_p0, %p3249_p11 }
  0x22   :  { %3259 = shalt.err (!%p3256_p1)
}
  0x23   :  { %s3338_s1 = smov 128   ;;  %s3339_s21 = smov 8  }
  0x24   :  { %26 = dma.hbm_to_vmem [thread:$0]  %s3933_s0, 256, %s21_s12, [#allocation6], %s3338_s1, %s3338_s1, %s3339_s21  }
  0x25   :  { %s3340_s24 = smov [#allocation10]   ;;  %s3341_s26 = smov [#allocation11]  }
  0x26   :  { %s44_s25 = sshll.u32 %s3340_s24, 4  ;;  %s58_s27 = sshll.u32 %s3341_s26, 4  ;;  %s45_s25 = int_to_ptr.vmem [resolvable:$true] %s44_s25  ;;  %s3413_s27 = int_to_ptr.vmem [resolvable:$true] %s58_s27 }
  0x27   :  { %s3260_s30 = scalar_lea.hbm %s3935_s2, 8192 }
  0x28   :  { %p3261_p2 = scmp.ne.s32.totalorder %s3935_s2, %s3260_s30  ;;  %p3264_p3 = scmp.lt.u32.totalorder %s3260_s30, %s3935_s2 }
  0x2a   :  { %p3266_p4 = pnand %p3264_p3, %p3261_p2 }
  0x2c   :  { %3269 = shalt.err (!%p3266_p4)
}
  0x2d   :  { %s3270_s0 = scalar_lea.vmem %s45_s25, 8192  ;;  %p3275_p6 = scmp.lt.s32.totalorder %s45_s25, %s45_s25 }
  0x2e   :  { %p3271_p5 = scmp.ne.s32.totalorder %s45_s25, %s3270_s0  ;;  %p3276_p7 = scmp.lt.s32.totalorder %s3270_s0, %s3270_s0 }
  0x30   :  { %p3277_p8 = por %p3276_p7, %p3275_p6 }
  0x32   :  { %p3278_p9 = pnand %p3277_p8, %p3271_p5 }
  0x34   :  { %3281 = shalt.err (!%p3278_p9)
}
  0x35   :  { %50 = dma.hbm_to_vmem [thread:$0]  %s3935_s2, 8192, %s45_s25, [#allocation9], %s3335_s7, %s3335_s7, %s3336_s8  }
  0x36   :  { %s3282_s17 = scalar_lea.hbm %s3937_s4, 2048 }
  0x37   :  { %p3283_p10 = scmp.ne.s32.totalorder %s3937_s4, %s3282_s17  ;;  %p3286_p11 = scmp.lt.u32.totalorder %s3282_s17, %s3937_s4 }
  0x39   :  { %p3288_p12 = pnand %p3286_p11, %p3283_p10 }
  0x3b   :  { %3291 = shalt.err (!%p3288_p12)
}
  0x3c   :  { %s3292_s23 = scalar_lea.vmem %s3413_s27, 2048  ;;  %p3297_p0 = scmp.lt.s32.totalorder %s3413_s27, %s3413_s27 }
  0x3d   :  { %p3293_p13 = scmp.ne.s32.totalorder %s3413_s27, %s3292_s23  ;;  %p3298_p1 = scmp.lt.s32.totalorder %s3292_s23, %s3292_s23 }
  0x3f   :  { %p3299_p2 = por %p3298_p1, %p3297_p0 }
  0x41   :  { %p3300_p3 = pnand %p3299_p2, %p3293_p13 }
  0x43   :  { %3303 = shalt.err (!%p3300_p3)
}
  0x44   :  { %64 = dma.hbm_to_vmem [thread:$0]  %s3937_s4, 2048, %s3413_s27, [#allocation12], %s3338_s1, %s3338_s1, %s3339_s21  }
  0x45   :  { %3326 = dma.done.wait [#allocation6], 256  }
  0x46   :  { %3327 = vsyncadd [#allocation6], 4294967040 }
  0x47   :  { %3328 = dma.done.wait [#allocation9], 12288  }
  0x48   :  { %3329 = vsyncadd [#allocation9], 4294955008 }
  0x49   :  { %3330 = dma.done.wait [#allocation12], 2048  }
  0x4a   :  { %3331 = vsyncadd [#allocation12], 4294965248  ;;  %v3342_v0 = vmov 0.0   ;;  %v86_v1 = vld [vmem:[#allocation8 + $0x8] sm:$0xff]  ;;  %v85_v3 = vld [vmem:[#allocation8] sm:$0xff]  ;;  %vm140_vm0 = vcmask 523264  }
  0x4b   :  { %208 = vmatprep.mubr.f32.mxu1 %v3342_v0  ;;  %83 = vst [vmem:[#allocation3] sm:$0x3] %v3342_v0  ;;  %84 = vst [vmem:[#allocation4] sm:$0x3] %v3342_v0  ;;  %454 = vmatprep.mubr.f32.mxu0 %v3342_v0  ;;  %v90_v2 = vld [vmem:[#allocation8 + $0x28] sm:$0xff]  ;;  %v89_v5 = vld [vmem:[#allocation8 + $0x20] sm:$0xff] }
  0x4c   :  { %v2474_v4 = vpack.c.bf16 %v90_v2, %v86_v1  ;;  %v94_v6 = vld [vmem:[#allocation8 + $0x48] sm:$0xff]  ;;  %v2476_v8 = vpack.c.bf16 %v89_v5, %v85_v3  ;;  %v93_v10 = vld [vmem:[#allocation8 + $0x40] sm:$0xff]  ;;  %v88_v24 = vld [vmem:[#allocation8 + $0x18] sm:$0xff]  ;;  %vm3346_vm2 = vmmov 0   ;;  %s3347_s21 = smov [#allocation13]  }
  0x4d   :  { %v98_v7 = vld [vmem:[#allocation8 + $0x68] sm:$0xff]  ;;  %v97_v11 = vld [vmem:[#allocation8 + $0x60] sm:$0xff]  ;;  %v92_v25 = vld [vmem:[#allocation8 + $0x38] sm:$0xff]  ;;  %s2382_s24 = sshll.u32 %s3347_s21, 4  ;;  %s2383_s24 = int_to_ptr.vmem [resolvable:$true] %s2382_s24 }
  0x4e   :  { %v2478_v9 = vpack.c.bf16 %v98_v7, %v94_v6  ;;  %v102_v12 = vld [vmem:[#allocation8 + $0x88] sm:$0xff]  ;;  %2475 = vmatprep.subr.bf16.mxu1 %v2474_v4  ;;  %2507 = vmatprep.subr.bf16.mxu0 %v2474_v4  ;;  %v2480_v14 = vpack.c.bf16 %v97_v11, %v93_v10  ;;  %v101_v16 = vld [vmem:[#allocation8 + $0x80] sm:$0xff]  ;;  %v3454_v29 = vpack.c.bf16 %v92_v25, %v88_v24  ;;  %v87_v30 = vld [vmem:[#allocation8 + $0x10] sm:$0xff]  ;;  %s3304_s25 = scalar_lea.vmem %s2383_s24, 32  ;;  %p3309_p5 = scmp.lt.s32.totalorder %s2383_s24, %s2383_s24 }
  0x4f   :  { %v106_v13 = vld [vmem:[#allocation8 + $0xa8] sm:$0xff]  ;;  %2477 = vmatpush1.bf16.msra.mxu1 %v2476_v8  ;;  %2509 = vmatpush1.bf16.msra.mxu0 %v2476_v8  ;;  %v105_v17 = vld [vmem:[#allocation8 + $0xa0] sm:$0xff]  ;;  %v91_v31 = vld [vmem:[#allocation8 + $0x30] sm:$0xff]  ;;  %p3305_p4 = scmp.ne.s32.totalorder %s2383_s24, %s3304_s25  ;;  %p3310_p6 = scmp.lt.s32.totalorder %s3304_s25, %s3304_s25 }
  0x50   :  { %2479 = vmatprep.subr.bf16.mxu1 %v2478_v9  ;;  %v2482_v15 = vpack.c.bf16 %v106_v13, %v102_v12  ;;  %2511 = vmatprep.subr.bf16.mxu0 %v2478_v9  ;;  %v110_v18 = vld [vmem:[#allocation8 + $0xc8] sm:$0xff]  ;;  %v2484_v20 = vpack.c.bf16 %v105_v17, %v101_v16  ;;  %v109_v22 = vld [vmem:[#allocation8 + $0xc0] sm:$0xff]  ;;  %v96_v32 = vld [vmem:[#allocation8 + $0x58] sm:$0xff]  ;;  %v3460_v40 = vpack.c.bf16 %v91_v31, %v87_v30 }
  0x51   :  { %v114_v19 = vld [vmem:[#allocation8 + $0xe8] sm:$0xff]  ;;  %v113_v23 = vld [vmem:[#allocation8 + $0xe0] sm:$0xff]  ;;  %v100_v34 = vld [vmem:[#allocation8 + $0x78] sm:$0xff]  ;;  %p3311_p7 = por %p3310_p6, %p3309_p5 }
  0x52   :  { %v2486_v21 = vpack.c.bf16 %v114_v19, %v110_v18  ;;  %v629_v26 = vld [vmem:[#allocation10 + $0x8] sm:$0xff]  ;;  %v2488_v28 = vpack.c.bf16 %v113_v23, %v109_v22  ;;  %v628_v35 = vld [vmem:[#allocation10] sm:$0xff]  ;;  %v3458_v39 = vld [vmem:[#allocation5] sm:$0xff]  ;;  %v3465_v42 = vpack.c.bf16 %v100_v34, %v96_v32 }
  0x53   :  { %2481 = vmatpush1.bf16.msra.mxu1 %v2480_v14  ;;  %2513 = vmatpush1.bf16.msra.mxu0 %v2480_v14  ;;  %v633_v27 = vld [vmem:[#allocation10 + $0x28] sm:$0xff]  ;;  %v632_v36 = vld [vmem:[#allocation10 + $0x20] sm:$0xff]  ;;  %v3462_v41 = vld [vmem:[#allocation5 + $0x8] sm:$0xff]  ;;  %p3312_p8 = pnand %p3311_p7, %p3305_p4 }
  0x54   :  { %2483 = vmatprep.subr.bf16.mxu1 %v2482_v15  ;;  %2515 = vmatprep.subr.bf16.mxu0 %v2482_v15  ;;  %v3456_v33 = vpack.c.bf16 %v633_v27, %v629_v26  ;;  %v637_v37 = vld [vmem:[#allocation10 + $0x48] sm:$0xff]  ;;  %v95_v43 = vld [vmem:[#allocation8 + $0x50] sm:$0xff]  ;;  %v104_v45 = vld [vmem:[#allocation8 + $0x98] sm:$0xff]  ;;  %v3468_v46 = vpack.c.bf16 %v632_v36, %v628_v35 }
  0x55   :  { %v641_v38 = vld [vmem:[#allocation10 + $0x68] sm:$0xff]  ;;  %v99_v44 = vld [vmem:[#allocation8 + $0x70] sm:$0xff]  ;;  %v108_v47 = vld [vmem:[#allocation8 + $0xb8] sm:$0xff] }
  0x56   :  { %v3470_v48 = vpack.c.bf16 %v641_v38, %v637_v37  ;;  %v636_v49 = vld [vmem:[#allocation10 + $0x40] sm:$0xff]  ;;  %v645_v51 = vld [vmem:[#allocation10 + $0x88] sm:$0xff]  ;;  %v3477_v53 = vpack.c.bf16 %v99_v44, %v95_v43  ;;  %v2498_v54 = vpack.c.bf16 %v108_v47, %v104_v45  ;;  %v103_v55 = vld [vmem:[#allocation8 + $0x90] sm:$0xff] }
  0x57   :  { %2485 = vmatpush1.bf16.msra.mxu1 %v2484_v20  ;;  %2517 = vmatpush1.bf16.msra.mxu0 %v2484_v20  ;;  %v640_v50 = vld [vmem:[#allocation10 + $0x60] sm:$0xff]  ;;  %v649_v52 = vld [vmem:[#allocation10 + $0xa8] sm:$0xff]  ;;  %v107_v56 = vld [vmem:[#allocation8 + $0xb0] sm:$0xff] }
  0x58   :  { %2487 = vmatprep.subr.bf16.mxu1 %v2486_v21  ;;  %2519 = vmatprep.subr.bf16.mxu0 %v2486_v21  ;;  %v112_v57 = vld [vmem:[#allocation8 + $0xd8] sm:$0xff]  ;;  %v3482_v58 = vpack.c.bf16 %v640_v50, %v636_v49  ;;  %v3485_v60 = vpack.c.bf16 %v649_v52, %v645_v51  ;;  %v644_v61 = vld [vmem:[#allocation10 + $0x80] sm:$0xff]  ;;  %v653_v63 = vld [vmem:[#allocation10 + $0xc8] sm:$0xff]  ;;  %v2500_v2 = vpack.c.bf16 %v107_v56, %v103_v55 }
  0x59   :  { %v116_v59 = vld [vmem:[#allocation8 + $0xf8] sm:$0xff]  ;;  %v648_v62 = vld [vmem:[#allocation10 + $0xa0] sm:$0xff]  ;;  %v657_v1 = vld [vmem:[#allocation10 + $0xe8] sm:$0xff] }
  0x5a   :  { %v2502_v3 = vpack.c.bf16 %v116_v59, %v112_v57  ;;  %v111_v4 = vld [vmem:[#allocation8 + $0xd0] sm:$0xff]  ;;  %v3490_v6 = vpack.c.bf16 %v648_v62, %v644_v61  ;;  %v3493_v7 = vpack.c.bf16 %v657_v1, %v653_v63  ;;  %v652_v8 = vld [vmem:[#allocation10 + $0xc0] sm:$0xff]  ;;  %v661_v10 = vld [vmem:[#allocation10 + $0x108] sm:$0xff] }
  0x5b   :  { %2489 = vmatpush1.bf16.msra.mxu1 %v2488_v28  ;;  %2521 = vmatpush1.bf16.msra.mxu0 %v2488_v28  ;;  %v115_v5 = vld [vmem:[#allocation8 + $0xf0] sm:$0xff]  ;;  %v656_v9 = vld [vmem:[#allocation10 + $0xe0] sm:$0xff]  ;;  %v665_v11 = vld [vmem:[#allocation10 + $0x128] sm:$0xff] }
  0x5c   :  { %2491 = vmatprep.subr.bf16.mxu1 %v3454_v29  ;;  %2539 = vmatprep.subr.bf16.mxu0 %v3456_v33  ;;  %v2504_v12 = vpack.c.bf16 %v115_v5, %v111_v4  ;;  %v3496_v13 = vpack.c.bf16 %v656_v9, %v652_v8  ;;  %v3499_v14 = vpack.c.bf16 %v665_v11, %v661_v10  ;;  %v660_v15 = vld [vmem:[#allocation10 + $0x100] sm:$0xff]  ;;  %v669_v17 = vld [vmem:[#allocation10 + $0x148] sm:$0xff]  ;;  %v631_v31 = vld [vmem:[#allocation10 + $0x18] sm:$0xff] }
  0x5d   :  { %v664_v16 = vld [vmem:[#allocation10 + $0x120] sm:$0xff]  ;;  %v673_v18 = vld [vmem:[#allocation10 + $0x168] sm:$0xff]  ;;  %v635_v34 = vld [vmem:[#allocation10 + $0x38] sm:$0xff] }
  0x5e   :  { %2393 = vmatmul.mubr.msk.f32.vlgmr.msra.gmra.mrb[0].mxu1 %vm140_vm0, %v3458_v39  ;;  %2395 = vmatmul.mubr.msk.f32.vlgmr.msra.gmra.mrb[0].mxu0 %vm140_vm0, %v3462_v41  ;;  %v3503_v19 = vpack.c.bf16 %v664_v16, %v660_v15  ;;  %v3506_v20 = vpack.c.bf16 %v673_v18, %v669_v17  ;;  %v668_v21 = vld [vmem:[#allocation10 + $0x140] sm:$0xff]  ;;  %v677_v23 = vld [vmem:[#allocation10 + $0x188] sm:$0xff]  ;;  %v3526_v38 = vpack.c.bf16 %v635_v34, %v631_v31  ;;  %v639_v43 = vld [vmem:[#allocation10 + $0x58] sm:$0xff] }
  0x5f   :  { %2493 = vmatpush1.bf16.msra.mxu1 %v3460_v40  ;;  %279 = vmatprep.mubr.f32.mxu1 %v3342_v0  ;;  %v672_v22 = vld [vmem:[#allocation10 + $0x160] sm:$0xff]  ;;  %v681_v24 = vld [vmem:[#allocation10 + $0x1a8] sm:$0xff]  ;;  %v643_v44 = vld [vmem:[#allocation10 + $0x78] sm:$0xff] }
  0x60   :  { %2495 = vmatprep.subr.bf16.mxu1 %v3465_v42  ;;  %2541 = vmatpush1.bf16.msra.mxu0 %v3468_v46  ;;  %v3514_v25 = vpack.c.bf16 %v672_v22, %v668_v21  ;;  %v3517_v26 = vpack.c.bf16 %v681_v24, %v677_v23  ;;  %v676_v27 = vld [vmem:[#allocation10 + $0x180] sm:$0xff]  ;;  %v689_v30 = vld [vmem:[#allocation10 + $0x1e8] sm:$0xff]  ;;  %v3535_v47 = vpack.c.bf16 %v643_v44, %v639_v43  ;;  %v638_v49 = vld [vmem:[#allocation10 + $0x50] sm:$0xff] }
  0x61   :  { %2543 = vmatprep.subr.bf16.mxu0 %v3470_v48  ;;  %759 = vmatprep.mubr.f32.mxu0 %v3342_v0  ;;  %v680_v28 = vld [vmem:[#allocation10 + $0x1a0] sm:$0xff]  ;;  %v642_v50 = vld [vmem:[#allocation10 + $0x70] sm:$0xff]  ;;  %v3538_v51 = vld [vmem:[#allocation3] sm:$0x3] }
  0x62   :  { %v3521_v32 = vpack.c.bf16 %v680_v28, %v676_v27  ;;  %v684_v36 = vld [vmem:[#allocation10 + $0x1c0] sm:$0xff]  ;;  %v647_v52 = vld [vmem:[#allocation10 + $0x98] sm:$0xff]  ;;  %v646_v56 = vld [vmem:[#allocation10 + $0x90] sm:$0xff] }
  0x63   :  { %2497 = vmatpush1.bf16.msra.mxu1 %v3477_v53  ;;  %v688_v37 = vld [vmem:[#allocation10 + $0x1e0] sm:$0xff]  ;;  %v650_v57 = vld [vmem:[#allocation10 + $0xb0] sm:$0xff]  ;;  %v655_v59 = vld [vmem:[#allocation10 + $0xd8] sm:$0xff] }
  0x64   :  { %2499 = vmatprep.subr.bf16.mxu1 %v2498_v54  ;;  %2545 = vmatpush1.bf16.msra.mxu0 %v3482_v58  ;;  %v659_v61 = vld [vmem:[#allocation10 + $0xf8] sm:$0xff]  ;;  %v654_v63 = vld [vmem:[#allocation10 + $0xd0] sm:$0xff]  ;;  %v117_v44 = vld [vmem:[%s3936_s3] sm:$0xf] }
  0x65   :  { %2547 = vmatprep.subr.bf16.mxu0 %v3485_v60  ;;  %v3558_v62 = vpack.c.bf16 %v659_v61, %v655_v59  ;;  %v658_v1 = vld [vmem:[#allocation10 + $0xf0] sm:$0xff]  ;;  %v671_v10 = vld [vmem:[#allocation10 + $0x158] sm:$0xff] }
  0x66   :  { %v3563_v4 = vpack.c.bf16 %v658_v1, %v654_v63  ;;  %v662_v8 = vld [vmem:[#allocation10 + $0x110] sm:$0xff]  ;;  %v675_v11 = vld [vmem:[#allocation10 + $0x178] sm:$0xff] }
  0x67   :  { %2501 = vmatpush1.bf16.msra.mxu1 %v2500_v2  ;;  %v666_v9 = vld [vmem:[#allocation10 + $0x130] sm:$0xff]  ;;  %v3574_v15 = vpack.c.bf16 %v675_v11, %v671_v10  ;;  %v679_v18 = vld [vmem:[#allocation10 + $0x198] sm:$0xff]  ;;  %v3343_v11 = vmov 1966171168  }
  0x68   :  { %2503 = vmatprep.subr.bf16.mxu1 %v2502_v3  ;;  %2549 = vmatpush1.bf16.msra.mxu0 %v3490_v6  ;;  %v670_v16 = vld [vmem:[#allocation10 + $0x150] sm:$0xff]  ;;  %v683_v21 = vld [vmem:[#allocation10 + $0x1b8] sm:$0xff] }
  0x69   :  { %2551 = vmatprep.subr.bf16.mxu0 %v3493_v7  ;;  %v674_v17 = vld [vmem:[#allocation10 + $0x170] sm:$0xff]  ;;  %v3582_v23 = vpack.c.bf16 %v683_v21, %v679_v18  ;;  %v687_v28 = vld [vmem:[#allocation10 + $0x1d8] sm:$0xff] }
  0x6a   :  { %v3579_v22 = vpack.c.bf16 %v674_v17, %v670_v16  ;;  %v678_v24 = vld [vmem:[#allocation10 + $0x190] sm:$0xff]  ;;  %v295_v16 = vunpack.c.l.s4 %v3343_v11 }
  0x6b   :  { %2505 = vmatpush1.bf16.msra.mxu1 %v2504_v12  ;;  %v682_v27 = vld [vmem:[#allocation10 + $0x1b0] sm:$0xff] }
  0x6c   :  { %2523 = vmatprep.subr.bf16.mxu1 %v3454_v29  ;;  %2553 = vmatpush1.bf16.msra.mxu0 %v3496_v13  ;;  %v685_v29 = vld [vmem:[#allocation10 + $0x1c8] sm:$0xff]  ;;  %v686_v34 = vld [vmem:[#allocation10 + $0x1d0] sm:$0xff]  ;;  %v296_v21 = vunpack.c.0.s8 %v295_v16 }
  0x6d   :  { %2555 = vmatprep.subr.bf16.mxu0 %v3499_v14  ;;  %v3524_v35 = vpack.c.bf16 %v689_v30, %v685_v29  ;;  %v691_v29 = vld [vmem:[#allocation10 + $0x1f8] sm:$0xff]  ;;  %v3587_v30 = vpack.c.bf16 %v682_v27, %v678_v24 }
  0x6e   :  { %2394 = vmatmul.mubr.msk.f32.vlgmr.msra.gmra.mrb[2].mxu1 %vm140_vm0, %v3458_v39  ;;  %v630_v39 = vld [vmem:[#allocation10 + $0x10] sm:$0xff]  ;;  %v3590_v31 = vpack.c.bf16 %v691_v29, %v687_v28 }
  0x6f   :  { %2525 = vmatpush1.bf16.msra.mxu1 %v3460_v40  ;;  %525 = vmatprep.mubr.f32.mxu1 %v3342_v0  ;;  %v634_v40 = vld [vmem:[#allocation10 + $0x30] sm:$0xff] }
  0x70   :  { %2527 = vmatprep.subr.bf16.mxu1 %v3465_v42  ;;  %2557 = vmatpush1.bf16.msra.mxu0 %v3503_v19  ;;  %v3529_v42 = vpack.c.bf16 %v688_v37, %v684_v36  ;;  %v3532_v45 = vpack.c.bf16 %v634_v40, %v630_v39  ;;  %v690_v36 = vld [vmem:[#allocation10 + $0x1f0] sm:$0xff]  ;;  %v120_v39 = vlaneseq }
  0x71   :  { %2559 = vmatprep.subr.bf16.mxu0 %v3506_v20  ;;  %v3595_v37 = vpack.c.bf16 %v690_v36, %v686_v34 }
  0x72   :  { %v3622_v40 = vshrl.u32 %v120_v39, 7  ;;  %vm3632_vm1 = vcmp.lt.s32.totalorder %v120_v39, 512 }
  0x73   :  { %2529 = vmatpush1.bf16.msra.mxu1 %v3477_v53  ;;  %v651_v53 = vld [vmem:[#allocation10 + $0xb8] sm:$0xff] }
  0x74   :  { %2531 = vmatprep.subr.bf16.mxu1 %v2498_v54  ;;  %2561 = vmatpush1.bf16.msra.mxu0 %v3514_v25  ;;  %v3544_v54 = vpack.c.bf16 %v642_v50, %v638_v49  ;;  %v3548_v55 = vpack.c.bf16 %v651_v53, %v647_v52  ;;  %v122_v43 = vsub.s32 0, %v3622_v40  ;;  %v126_v49 = vsub.s32 1, %v3622_v40 }
  0x75   :  { %2563 = vmatprep.subr.bf16.mxu0 %v3517_v26  ;;  %v130_v10 = vsub.s32 2, %v3622_v40  ;;  %v134_v17 = vsub.s32 3, %v3622_v40  ;;  %v299_v34 = vsub.s32 %v296_v21, %v3622_v40 }
  0x76   :  { %v123_v50 = vrot.slane %v117_v44, %v122_v43 }
  0x77   :  { %2533 = vmatpush1.bf16.msra.mxu1 %v2500_v2  ;;  %v663_v2 = vld [vmem:[#allocation10 + $0x118] sm:$0xff]  ;;  %v131_v18 = vrot.slane %v117_v44, %v130_v10  ;;  %v135_v24 = vrot.slane %v117_v44, %v134_v17 }
  0x78   :  { %2535 = vmatprep.subr.bf16.mxu1 %v2502_v3  ;;  %2565 = vmatpush1.bf16.msra.mxu0 %v3521_v32  ;;  %v667_v3 = vld [vmem:[#allocation10 + $0x138] sm:$0xff] }
  0x79   :  { %2567 = vmatprep.subr.bf16.mxu0 %v3524_v35  ;;  %v3566_v5 = vpack.c.bf16 %v667_v3, %v663_v2 }
  0x7b   :  { %2537 = vmatpush1.bf16.msra.mxu1 %v2504_v12  ;;  %v3571_v12 = vpack.c.bf16 %v666_v9, %v662_v8 }
  0x7c   :  { %2571 = vmatprep.subr.bf16.mxu1 %v3526_v38  ;;  %2569 = vmatpush1.bf16.msra.mxu0 %v3529_v42 }
  0x7d   :  { %2603 = vmatprep.subr.bf16.mxu0 %v3456_v33 }
  0x7e   :  { %2396 = vmatmul.mubr.msk.f32.vlgmr.msra.gmra.mrb[4].mxu1 %vm140_vm0, %v3462_v41  ;;  %v3555_v41 = vpack.c.bf16 %v650_v57, %v646_v56 }
  0x7f   :  { %2573 = vmatpush1.bf16.msra.mxu1 %v3532_v45  ;;  %760 = vmatmul.mubr.f32.vlgmr.msra.gmra.mrb[2].mxu0 %v3538_v51 }
  0x80   :  { %2575 = vmatprep.subr.bf16.mxu1 %v3535_v47  ;;  %830 = vmatprep.mubr.f32.mxu1 %v3342_v0 }
  0x81   :  { %2605 = vmatpush1.bf16.msra.mxu0 %v3468_v46  ;;  %957 = vmatprep.mubr.f32.mxu0 %v3342_v0 }
  0x82   :  { %2607 = vmatprep.subr.bf16.mxu0 %v3470_v48 }
  0x83   :  { %2577 = vmatpush1.bf16.msra.mxu1 %v3544_v54 }
  0x84   :  { %2579 = vmatprep.subr.bf16.mxu1 %v3548_v55 }
  0x85   :  { %2609 = vmatpush1.bf16.msra.mxu0 %v3482_v58 }
  0x86   :  { %2611 = vmatprep.subr.bf16.mxu0 %v3485_v60 }
  0x87   :  { %2581 = vmatpush1.bf16.msra.mxu1 %v3555_v41 }
  0x88   :  { %2583 = vmatprep.subr.bf16.mxu1 %v3558_v62 }
  0x89   :  { %2613 = vmatpush1.bf16.msra.mxu0 %v3490_v6 }
  0x8a   :  { %2615 = vmatprep.subr.bf16.mxu0 %v3493_v7 }
  0x8b   :  { %2585 = vmatpush1.bf16.msra.mxu1 %v3563_v4 }
  0x8c   :  { %2587 = vmatprep.subr.bf16.mxu1 %v3566_v5 }
  0x8d   :  { %2617 = vmatpush1.bf16.msra.mxu0 %v3496_v13 }
  0x8e   :  { %2619 = vmatprep.subr.bf16.mxu0 %v3499_v14 }
  0x8f   :  { %2589 = vmatpush1.bf16.msra.mxu1 %v3571_v12 }
  0x90   :  { %2591 = vmatprep.subr.bf16.mxu1 %v3574_v15 }
  0x91   :  { %2621 = vmatpush1.bf16.msra.mxu0 %v3503_v19 }
  0x92   :  { %2623 = vmatprep.subr.bf16.mxu0 %v3506_v20 }
  0x93   :  { %2593 = vmatpush1.bf16.msra.mxu1 %v3579_v22 }
  0x94   :  { %2595 = vmatprep.subr.bf16.mxu1 %v3582_v23 }
  0x95   :  { %2625 = vmatpush1.bf16.msra.mxu0 %v3514_v25 }
  0x96   :  { %2627 = vmatprep.subr.bf16.mxu0 %v3517_v26 }
  0x97   :  { %2597 = vmatpush1.bf16.msra.mxu1 %v3587_v30 }
  0x98   :  { %2599 = vmatprep.subr.bf16.mxu1 %v3590_v31 }
  0x99   :  { %2629 = vmatpush1.bf16.msra.mxu0 %v3521_v32 }
  0x9a   :  { %2631 = vmatprep.subr.bf16.mxu0 %v3524_v35 }
  0x9b   :  { %2601 = vmatpush1.bf16.msra.mxu1 %v3595_v37 }
  0x9c   :  { %2635 = vmatprep.subr.bf16.mxu1 %v3526_v38 }
  0x9d   :  { %2633 = vmatpush1.bf16.msra.mxu0 %v3529_v42 }
  0x9e   :  { %831 = vmatmul.mubr.f32.vlgmr.msra.gmra.mrb[6].mxu1 %v3538_v51  ;;  %2667 = vmatprep.subr.bf16.mxu0 %v3456_v33  ;;  %v127_v51 = vrot.slane %v117_v44, %v126_v49 }
  0x9f   :  { %2637 = vmatpush1.bf16.msra.mxu1 %v3532_v45  ;;  %1028 = vmatprep.mubr.f32.mxu1 %v3342_v0 }
  0xa0   :  { %2639 = vmatprep.subr.bf16.mxu1 %v3535_v47 }
  0xa3   :  { %2641 = vmatpush1.bf16.msra.mxu1 %v3544_v54 }
  0xa4   :  { %2643 = vmatprep.subr.bf16.mxu1 %v3548_v55 }
  0xa7   :  { %2645 = vmatpush1.bf16.msra.mxu1 %v3555_v41 }
  0xa8   :  { %2647 = vmatprep.subr.bf16.mxu1 %v3558_v62 }
  0xab   :  { %2649 = vmatpush1.bf16.msra.mxu1 %v3563_v4 }
  0xac   :  { %2651 = vmatprep.subr.bf16.mxu1 %v3566_v5 }
  0xaf   :  { %2653 = vmatpush1.bf16.msra.mxu1 %v3571_v12 }
  0xb0   :  { %2655 = vmatprep.subr.bf16.mxu1 %v3574_v15 }
  0xb3   :  { %2657 = vmatpush1.bf16.msra.mxu1 %v3579_v22 }
  0xb4   :  { %2659 = vmatprep.subr.bf16.mxu1 %v3582_v23 }
  0xb7   :  { %2661 = vmatpush1.bf16.msra.mxu1 %v3587_v30 }
  0xb8   :  { %2663 = vmatprep.subr.bf16.mxu1 %v3590_v31 }
  0xbb   :  { %2665 = vmatpush1.bf16.msra.mxu1 %v3595_v37 }
  0xbc   :  { %2699 = vmatprep.subr.bf16.mxu1 %v3526_v38 }
 0x131   :  { %v210_v52 = vpop.f32.mrb[0].mxu1  ;;  %v456_v53 = vpop.f32.mrb[0].mxu0 }
 0x132   :  { %v211_v56 = vadd.f32 %v210_v52, %v123_v50  ;;  %v212_v57 = vpop.f32.mrb[1].mxu1  ;;  %v457_v59 = vadd.f32 %v456_v53, %v123_v50  ;;  %v458_v61 = vpop.f32.mrb[1].mxu0 }
 0x133   :  { %v213_v63 = vadd.f32 %v212_v57, %v127_v51  ;;  %v459_v1 = vadd.f32 %v458_v61, %v127_v51 }
 0x135   :  { %v290_v2 = vcombine.low %v211_v56, %v213_v63  ;;  %v291_v3 = vcombine.high %v211_v56, %v213_v63  ;;  %v536_v8 = vcombine.low %v457_v59, %v459_v1  ;;  %v537_v9 = vcombine.high %v457_v59, %v459_v1 }
 0x137   :  { %v300_v50 = vrot.slane %v290_v2, %v299_v34  ;;  %v307_v51 = vrot.slane %v291_v3, %v299_v34 }
 0x141   :  { %v281_v27 = vpop.f32.mrb[2].mxu1 }
 0x142   :  { %v282_v28 = vadd.f32 %v281_v27, %v131_v18  ;;  %v283_v29 = vpop.f32.mrb[3].mxu1 }
 0x143   :  { %v284_v36 = vadd.f32 %v283_v29, %v135_v24 }
 0x145   :  { %v292_v43 = vcombine.low %v282_v28, %v284_v36  ;;  %v293_v49 = vcombine.high %v282_v28, %v284_v36 }
 0x147   :  { %v314_v52 = vrot.slane %v292_v43, %v299_v34  ;;  %v321_v53 = vrot.slane %v293_v49, %v299_v34  ;;  %v546_v49 = vrot.slane %v536_v8, %v299_v34  ;;  %v3344_v8 = vmov 1983009808  }
 0x149   :  { %v322_v56 = vcombine.low %v300_v50, %v314_v52  ;;  %v323_v57 = vcombine.high %v300_v50, %v314_v52  ;;  %v324_v59 = vcombine.low %v307_v51, %v321_v53  ;;  %v325_v61 = vcombine.high %v307_v51, %v321_v53 }
 0x14a   :  { %v553_v50 = vrot.slane %v537_v9, %v299_v34  ;;  %v844_v9 = vunpack.c.l.s4 %v3344_v8 }
 0x14b   :  { %v332_v44 = vrot.slane %v322_v56, %v299_v34  ;;  %v339_v1 = vrot.slane %v324_v59, %v299_v34  ;;  %v346_v10 = vrot.slane %v323_v57, %v299_v34  ;;  %v353_v11 = vrot.slane %v325_v61, %v299_v34 }
 0x14d   :  { %v354_v16 = vcombine.high %v332_v44, %v332_v44  ;;  %v355_v17 = vcombine.high %v339_v1, %v339_v1  ;;  %v356_v21 = vcombine.high %v346_v10, %v346_v10  ;;  %v357_v27 = vcombine.high %v353_v11, %v353_v11  ;;  %370 = vst.msk [vmem:[#allocation2] ss:$2 sm:$0xf] %vm3632_vm1, %v332_v44 }
 0x14e   :  { %372 = vst.msk [vmem:[#allocation2 + $0x8] ss:$2 sm:$0xf] %vm3632_vm1, %v346_v10  ;;  %378 = vst.msk [vmem:[#allocation2 + $0x20] ss:$2 sm:$0xf] %vm3632_vm1, %v339_v1 }
 0x14f   :  { %380 = vst.msk [vmem:[#allocation2 + $0x28] ss:$2 sm:$0xf] %vm3632_vm1, %v353_v11  ;;  %374 = vst.msk [vmem:[#allocation2 + $0x10] ss:$2 sm:$0xf] %vm3632_vm1, %v354_v16 }
 0x150   :  { %376 = vst.msk [vmem:[#allocation2 + $0x18] ss:$2 sm:$0xf] %vm3632_vm1, %v356_v21  ;;  %382 = vst.msk [vmem:[#allocation2 + $0x30] ss:$2 sm:$0xf] %vm3632_vm1, %v355_v17 }
 0x151   :  { %384 = vst.msk [vmem:[#allocation2 + $0x38] ss:$2 sm:$0xf] %vm3632_vm1, %v357_v27  ;;  %v527_v39 = vpop.f32.mrb[4].mxu1 }
 0x152   :  { %v528_v2 = vadd.f32 %v527_v39, %v131_v18  ;;  %v529_v3 = vpop.f32.mrb[5].mxu1  ;;  %v761_v28 = vpop.f32.mrb[2].mxu0 }
 0x153   :  { %v530_v29 = vadd.f32 %v529_v3, %v135_v24  ;;  %v763_v36 = vpop.f32.mrb[3].mxu0 }
 0x154   :  { %v841_v43 = vcombine.low %v761_v28, %v763_v36 }
 0x155   :  { %v538_v51 = vcombine.low %v528_v2, %v530_v29  ;;  %v539_v52 = vcombine.high %v528_v2, %v530_v29 }
 0x157   :  { %v560_v53 = vrot.slane %v538_v51, %v299_v34  ;;  %v567_v56 = vrot.slane %v539_v52, %v299_v34 }
 0x159   :  { %v568_v57 = vcombine.low %v546_v49, %v560_v53  ;;  %v569_v59 = vcombine.high %v546_v49, %v560_v53  ;;  %v570_v61 = vcombine.low %v553_v50, %v567_v56  ;;  %v571_v44 = vcombine.high %v553_v50, %v567_v56 }
 0x15b   :  { %v578_v1 = vrot.slane %v568_v57, %v299_v34  ;;  %v585_v10 = vrot.slane %v570_v61, %v299_v34  ;;  %v592_v11 = vrot.slane %v569_v59, %v299_v34  ;;  %v599_v16 = vrot.slane %v571_v44, %v299_v34 }
 0x15c   :  { %v845_v34 = vunpack.c.0.s8 %v844_v9 }
 0x15d   :  { %v600_v18 = vcombine.high %v578_v1, %v578_v1  ;;  %v601_v17 = vcombine.high %v585_v10, %v585_v10  ;;  %v602_v21 = vcombine.high %v592_v11, %v592_v11  ;;  %v603_v24 = vcombine.high %v599_v16, %v599_v16  ;;  %613 = vst.msk [vmem:[#allocation2 + $0x1] ss:$2 sm:$0xf] %vm3632_vm1, %v578_v1 }
 0x15e   :  { %615 = vst.msk [vmem:[#allocation2 + $0x9] ss:$2 sm:$0xf] %vm3632_vm1, %v592_v11  ;;  %621 = vst.msk [vmem:[#allocation2 + $0x21] ss:$2 sm:$0xf] %vm3632_vm1, %v585_v10  ;;  %v3669_v27 = vsub.s32 %v845_v34, %v3622_v40 }
 0x15f   :  { %623 = vst.msk [vmem:[#allocation2 + $0x29] ss:$2 sm:$0xf] %vm3632_vm1, %v599_v16  ;;  %617 = vst.msk [vmem:[#allocation2 + $0x11] ss:$2 sm:$0xf] %vm3632_vm1, %v600_v18 }
 0x160   :  { %619 = vst.msk [vmem:[#allocation2 + $0x19] ss:$2 sm:$0xf] %vm3632_vm1, %v602_v21  ;;  %625 = vst.msk [vmem:[#allocation2 + $0x31] ss:$2 sm:$0xf] %vm3632_vm1, %v601_v17  ;;  %v849_v3 = vrot.slane %v841_v43, %v3669_v27 }
 0x161   :  { %627 = vst.msk [vmem:[#allocation2 + $0x39] ss:$2 sm:$0xf] %vm3632_vm1, %v603_v24  ;;  %v693_v10 = vld [vmem:[#allocation4] sm:$0x3] }
 0x164   :  { %v694_v49 = vld [vmem:[#allocation2] sm:$0xff] }
 0x171   :  { %v832_v39 = vpop.f32.mrb[6].mxu1 }
 0x172   :  { %v834_v2 = vpop.f32.mrb[7].mxu1 }
 0x173   :  { %v842_v28 = vcombine.low %v832_v39, %v834_v2 }
 0x175   :  { %v856_v29 = vrot.slane %v842_v28, %v3669_v27 }
 0x177   :  { %v857_v36 = vcombine.low %v849_v3, %v856_v29 }
 0x179   :  { %v859_v50 = vadd.f32 %v857_v36, %v694_v49 }
 0x17b   :  { %v2397_v51 = vmul.f32 -1.442695, %v859_v50  ;;  %v867_v52 = vrot.slane %v859_v50, 2  ;;  %v878_v53 = vrot.slane %v859_v50, 6  ;;  %v875_v40 = vrot.slane %v859_v50, 4 }
 0x17d   :  { %3088 = vpow2.f32 %v2397_v51  ;;  %v2398_v63 = vmul.f32 -1.442695, %v867_v52  ;;  %v2399_v56 = vmul.f32 -1.442695, %v878_v53  ;;  %v892_v52 = vld [vmem:[#allocation2 + $0x8] sm:$0xff] }
 0x17f   :  { %3090 = vpow2.f32 %v2398_v63 }
 0x180   :  { %3092 = vpow2.f32 %v2399_v56 }
 0x187   :  { %v3089_v57 = vpop.eup %3088 }
 0x188   :  { %v863_v59 = vadd.f32 1.0, %v3089_v57 }
 0x189   :  { %v3091_v61 = vpop.eup %3090 }
 0x18a   :  { %3094 = vrcp.f32 %v863_v59  ;;  %v872_v43 = vadd.f32 1.0, %v3091_v61  ;;  %v3093_v44 = vpop.eup %3092 }
 0x18b   :  { %3096 = vtanh.f32 %v875_v40  ;;  %v883_v18 = vadd.f32 1.0, %v3093_v44 }
 0x18c   :  { %3098 = vrcp.f32 %v872_v43 }
 0x18d   :  { %3100 = vrcp.f32 %v883_v18 }
 0x194   :  { %v3095_v1 = vpop.eup %3094 }
 0x195   :  { %v3097_v11 = vpop.eup %3096 }
 0x196   :  { %v3099_v16 = vpop.eup %3098  ;;  %v887_v21 = vmul.f32 %v3097_v11, %v3095_v1 }
 0x197   :  { %v886_v17 = vmul.f32 %v3099_v16, %v693_v10  ;;  %v3101_v8 = vpop.eup %3100 }
 0x199   :  { %v3673_v24 = vadd.f32 %v887_v21, %v886_v17 }
 0x19b   :  { %3102 = vtanh.f32 %v3673_v24 }
 0x1a5   :  { %v3103_v9 = vpop.eup %3102 }
 0x1a6   :  { %v890_v34 = vmul.f32 %v3103_v9, %v3101_v8 }
 0x1a8   :  { %958 = vmatmul.mubr.f32.vlgmr.msra.gmra.mrb[4].mxu0 %v890_v34  ;;  %1029 = vmatmul.mubr.f32.vlgmr.msra.gmra.mrb[8].mxu1 %v890_v34 }
 0x1a9   :  { %2669 = vmatpush1.bf16.msra.mxu0 %v3468_v46  ;;  %2701 = vmatpush1.bf16.msra.mxu1 %v3532_v45 }
 0x1aa   :  { %2671 = vmatprep.subr.bf16.mxu0 %v3470_v48  ;;  %2703 = vmatprep.subr.bf16.mxu1 %v3535_v47 }
 0x1ab   :  { %1155 = vmatprep.mubr.f32.mxu0 %v3342_v0  ;;  %1226 = vmatprep.mubr.f32.mxu1 %v3342_v0 }
 0x1ad   :  { %2673 = vmatpush1.bf16.msra.mxu0 %v3482_v58  ;;  %2705 = vmatpush1.bf16.msra.mxu1 %v3544_v54 }
 0x1ae   :  { %2675 = vmatprep.subr.bf16.mxu0 %v3485_v60  ;;  %2707 = vmatprep.subr.bf16.mxu1 %v3548_v55 }
 0x1b1   :  { %2677 = vmatpush1.bf16.msra.mxu0 %v3490_v6  ;;  %2709 = vmatpush1.bf16.msra.mxu1 %v3555_v41 }
 0x1b2   :  { %2679 = vmatprep.subr.bf16.mxu0 %v3493_v7  ;;  %2711 = vmatprep.subr.bf16.mxu1 %v3558_v62 }
 0x1b5   :  { %2681 = vmatpush1.bf16.msra.mxu0 %v3496_v13  ;;  %2713 = vmatpush1.bf16.msra.mxu1 %v3563_v4 }
 0x1b6   :  { %2683 = vmatprep.subr.bf16.mxu0 %v3499_v14  ;;  %2715 = vmatprep.subr.bf16.mxu1 %v3566_v5 }
 0x1b9   :  { %2685 = vmatpush1.bf16.msra.mxu0 %v3503_v19  ;;  %2717 = vmatpush1.bf16.msra.mxu1 %v3571_v12 }
 0x1ba   :  { %2687 = vmatprep.subr.bf16.mxu0 %v3506_v20  ;;  %2719 = vmatprep.subr.bf16.mxu1 %v3574_v15 }
 0x1bd   :  { %2689 = vmatpush1.bf16.msra.mxu0 %v3514_v25  ;;  %2721 = vmatpush1.bf16.msra.mxu1 %v3579_v22 }
 0x1be   :  { %2691 = vmatprep.subr.bf16.mxu0 %v3517_v26  ;;  %2723 = vmatprep.subr.bf16.mxu1 %v3582_v23 }
 0x1c1   :  { %2693 = vmatpush1.bf16.msra.mxu0 %v3521_v32  ;;  %2725 = vmatpush1.bf16.msra.mxu1 %v3587_v30 }
 0x1c2   :  { %2695 = vmatprep.subr.bf16.mxu0 %v3524_v35  ;;  %2727 = vmatprep.subr.bf16.mxu1 %v3590_v31 }
 0x1c5   :  { %2697 = vmatpush1.bf16.msra.mxu0 %v3529_v42  ;;  %2729 = vmatpush1.bf16.msra.mxu1 %v3595_v37 }
 0x1c6   :  { %2731 = vmatprep.subr.bf16.mxu0 %v3456_v33  ;;  %2763 = vmatprep.subr.bf16.mxu1 %v3526_v38 }
 0x27b   :  { %v959_v39 = vpop.f32.mrb[4].mxu0  ;;  %v1030_v2 = vpop.f32.mrb[8].mxu1 }
 0x27c   :  { %v961_v3 = vpop.f32.mrb[5].mxu0  ;;  %v1032_v28 = vpop.f32.mrb[9].mxu1 }
 0x27d   :  { %v1039_v29 = vcombine.low %v959_v39, %v961_v3  ;;  %v1040_v36 = vcombine.low %v1030_v2, %v1032_v28 }
 0x27f   :  { %v1047_v49 = vrot.slane %v1039_v29, %v3669_v27  ;;  %v1054_v50 = vrot.slane %v1040_v36, %v3669_v27 }
 0x281   :  { %v1055_v51 = vcombine.low %v1047_v49, %v1054_v50 }
 0x283   :  { %v1057_v63 = vadd.f32 %v1055_v51, %v892_v52 }
 0x285   :  { %v2400_v53 = vmul.f32 -1.442695, %v1057_v63  ;;  %v1065_v56 = vrot.slane %v1057_v63, 2  ;;  %v1076_v40 = vrot.slane %v1057_v63, 6  ;;  %v1073_v43 = vrot.slane %v1057_v63, 4 }
 0x287   :  { %3104 = vpow2.f32 %v2400_v53  ;;  %v2401_v57 = vmul.f32 -1.442695, %v1065_v56  ;;  %v2402_v59 = vmul.f32 -1.442695, %v1076_v40  ;;  %v1090_v53 = vld [vmem:[#allocation2 + $0x10] sm:$0xff] }
 0x289   :  { %3106 = vpow2.f32 %v2401_v57 }
 0x28a   :  { %3108 = vpow2.f32 %v2402_v59 }
 0x291   :  { %v3105_v61 = vpop.eup %3104 }
 0x292   :  { %v1061_v44 = vadd.f32 1.0, %v3105_v61 }
 0x293   :  { %v3107_v1 = vpop.eup %3106 }
 0x294   :  { %3110 = vrcp.f32 %v1061_v44  ;;  %v1070_v10 = vadd.f32 1.0, %v3107_v1  ;;  %v3109_v11 = vpop.eup %3108 }
 0x295   :  { %3112 = vtanh.f32 %v1073_v43  ;;  %v1081_v21 = vadd.f32 1.0, %v3109_v11 }
 0x296   :  { %3114 = vrcp.f32 %v1070_v10 }
 0x297   :  { %3116 = vrcp.f32 %v1081_v21 }
 0x29e   :  { %v3111_v16 = vpop.eup %3110 }
 0x29f   :  { %v3113_v18 = vpop.eup %3112 }
 0x2a0   :  { %v3115_v17 = vpop.eup %3114  ;;  %v1085_v9 = vmul.f32 %v3113_v18, %v3111_v16 }
 0x2a1   :  { %v1084_v8 = vmul.f32 %v3115_v17, %v3673_v24  ;;  %v3117_v39 = vpop.eup %3116 }
 0x2a3   :  { %v3713_v34 = vadd.f32 %v1085_v9, %v1084_v8 }
 0x2a5   :  { %3118 = vtanh.f32 %v3713_v34 }
 0x2af   :  { %v3119_v2 = vpop.eup %3118 }
 0x2b0   :  { %v1088_v3 = vmul.f32 %v3119_v2, %v3117_v39 }
 0x2b2   :  { %1156 = vmatmul.mubr.f32.vlgmr.msra.gmra.mrb[6].mxu0 %v1088_v3  ;;  %1227 = vmatmul.mubr.f32.vlgmr.msra.gmra.mrb[10].mxu1 %v1088_v3 }
 0x2b3   :  { %2733 = vmatpush1.bf16.msra.mxu0 %v3468_v46  ;;  %2765 = vmatpush1.bf16.msra.mxu1 %v3532_v45 }
 0x2b4   :  { %2735 = vmatprep.subr.bf16.mxu0 %v3470_v48  ;;  %2767 = vmatprep.subr.bf16.mxu1 %v3535_v47 }
 0x2b5   :  { %1353 = vmatprep.mubr.f32.mxu0 %v3342_v0  ;;  %1424 = vmatprep.mubr.f32.mxu1 %v3342_v0 }
 0x2b7   :  { %2737 = vmatpush1.bf16.msra.mxu0 %v3482_v58  ;;  %2769 = vmatpush1.bf16.msra.mxu1 %v3544_v54 }
 0x2b8   :  { %2739 = vmatprep.subr.bf16.mxu0 %v3485_v60  ;;  %2771 = vmatprep.subr.bf16.mxu1 %v3548_v55 }
 0x2bb   :  { %2741 = vmatpush1.bf16.msra.mxu0 %v3490_v6  ;;  %2773 = vmatpush1.bf16.msra.mxu1 %v3555_v41 }
 0x2bc   :  { %2743 = vmatprep.subr.bf16.mxu0 %v3493_v7  ;;  %2775 = vmatprep.subr.bf16.mxu1 %v3558_v62 }
 0x2bf   :  { %2745 = vmatpush1.bf16.msra.mxu0 %v3496_v13  ;;  %2777 = vmatpush1.bf16.msra.mxu1 %v3563_v4 }
 0x2c0   :  { %2747 = vmatprep.subr.bf16.mxu0 %v3499_v14  ;;  %2779 = vmatprep.subr.bf16.mxu1 %v3566_v5 }
 0x2c3   :  { %2749 = vmatpush1.bf16.msra.mxu0 %v3503_v19  ;;  %2781 = vmatpush1.bf16.msra.mxu1 %v3571_v12 }
 0x2c4   :  { %2751 = vmatprep.subr.bf16.mxu0 %v3506_v20  ;;  %2783 = vmatprep.subr.bf16.mxu1 %v3574_v15 }
 0x2c7   :  { %2753 = vmatpush1.bf16.msra.mxu0 %v3514_v25  ;;  %2785 = vmatpush1.bf16.msra.mxu1 %v3579_v22 }
 0x2c8   :  { %2755 = vmatprep.subr.bf16.mxu0 %v3517_v26  ;;  %2787 = vmatprep.subr.bf16.mxu1 %v3582_v23 }
 0x2cb   :  { %2757 = vmatpush1.bf16.msra.mxu0 %v3521_v32  ;;  %2789 = vmatpush1.bf16.msra.mxu1 %v3587_v30 }
 0x2cc   :  { %2759 = vmatprep.subr.bf16.mxu0 %v3524_v35  ;;  %2791 = vmatprep.subr.bf16.mxu1 %v3590_v31 }
 0x2cf   :  { %2761 = vmatpush1.bf16.msra.mxu0 %v3529_v42  ;;  %2793 = vmatpush1.bf16.msra.mxu1 %v3595_v37 }
 0x2d0   :  { %2795 = vmatprep.subr.bf16.mxu0 %v3456_v33  ;;  %2827 = vmatprep.subr.bf16.mxu1 %v3526_v38 }
 0x385   :  { %v1157_v24 = vpop.f32.mrb[6].mxu0  ;;  %v1228_v28 = vpop.f32.mrb[10].mxu1 }
 0x386   :  { %v1159_v29 = vpop.f32.mrb[7].mxu0  ;;  %v1230_v36 = vpop.f32.mrb[11].mxu1 }
 0x387   :  { %v1237_v49 = vcombine.low %v1157_v24, %v1159_v29  ;;  %v1238_v50 = vcombine.low %v1228_v28, %v1230_v36 }
 0x389   :  { %v1245_v51 = vrot.slane %v1237_v49, %v3669_v27  ;;  %v1252_v52 = vrot.slane %v1238_v50, %v3669_v27 }
 0x38b   :  { %v1253_v63 = vcombine.low %v1245_v51, %v1252_v52 }
 0x38d   :  { %v1255_v56 = vadd.f32 %v1253_v63, %v1090_v53 }
 0x38f   :  { %v2403_v57 = vmul.f32 -1.442695, %v1255_v56  ;;  %v1263_v40 = vrot.slane %v1255_v56, 2  ;;  %v1274_v61 = vrot.slane %v1255_v56, 6  ;;  %v1271_v1 = vrot.slane %v1255_v56, 4 }
 0x391   :  { %3120 = vpow2.f32 %v2403_v57  ;;  %v2404_v59 = vmul.f32 -1.442695, %v1263_v40  ;;  %v2405_v43 = vmul.f32 -1.442695, %v1274_v61  ;;  %v1288_v57 = vld [vmem:[#allocation2 + $0x18] sm:$0xff] }
 0x393   :  { %3122 = vpow2.f32 %v2404_v59 }
 0x394   :  { %3124 = vpow2.f32 %v2405_v43 }
 0x39b   :  { %v3121_v44 = vpop.eup %3120 }
 0x39c   :  { %v1259_v10 = vadd.f32 1.0, %v3121_v44 }
 0x39d   :  { %v3123_v11 = vpop.eup %3122 }
 0x39e   :  { %3126 = vrcp.f32 %v1259_v10  ;;  %v1268_v16 = vadd.f32 1.0, %v3123_v11  ;;  %v3125_v18 = vpop.eup %3124 }
 0x39f   :  { %3128 = vtanh.f32 %v1271_v1  ;;  %v1279_v9 = vadd.f32 1.0, %v3125_v18 }
 0x3a0   :  { %3130 = vrcp.f32 %v1268_v16 }
 0x3a1   :  { %3132 = vrcp.f32 %v1279_v9 }
 0x3a8   :  { %v3127_v17 = vpop.eup %3126 }
 0x3a9   :  { %v3129_v21 = vpop.eup %3128 }
 0x3aa   :  { %v3131_v8 = vpop.eup %3130  ;;  %v1283_v2 = vmul.f32 %v3129_v21, %v3127_v17 }
 0x3ab   :  { %v1282_v39 = vmul.f32 %v3131_v8, %v3713_v34  ;;  %v3133_v24 = vpop.eup %3132 }
 0x3ad   :  { %v3753_v3 = vadd.f32 %v1283_v2, %v1282_v39 }
 0x3af   :  { %3134 = vtanh.f32 %v3753_v3 }
 0x3b9   :  { %v3135_v28 = vpop.eup %3134 }
 0x3ba   :  { %v1286_v29 = vmul.f32 %v3135_v28, %v3133_v24 }
 0x3bc   :  { %1354 = vmatmul.mubr.f32.vlgmr.msra.gmra.mrb[8].mxu0 %v1286_v29  ;;  %1425 = vmatmul.mubr.f32.vlgmr.msra.gmra.mrb[12].mxu1 %v1286_v29 }
 0x3bd   :  { %2797 = vmatpush1.bf16.msra.mxu0 %v3468_v46  ;;  %2829 = vmatpush1.bf16.msra.mxu1 %v3532_v45 }
 0x3be   :  { %2799 = vmatprep.subr.bf16.mxu0 %v3470_v48  ;;  %2831 = vmatprep.subr.bf16.mxu1 %v3535_v47 }
 0x3bf   :  { %1551 = vmatprep.mubr.f32.mxu0 %v3342_v0  ;;  %1622 = vmatprep.mubr.f32.mxu1 %v3342_v0 }
 0x3c1   :  { %2801 = vmatpush1.bf16.msra.mxu0 %v3482_v58  ;;  %2833 = vmatpush1.bf16.msra.mxu1 %v3544_v54 }
 0x3c2   :  { %2803 = vmatprep.subr.bf16.mxu0 %v3485_v60  ;;  %2835 = vmatprep.subr.bf16.mxu1 %v3548_v55 }
 0x3c5   :  { %2805 = vmatpush1.bf16.msra.mxu0 %v3490_v6  ;;  %2837 = vmatpush1.bf16.msra.mxu1 %v3555_v41 }
 0x3c6   :  { %2807 = vmatprep.subr.bf16.mxu0 %v3493_v7  ;;  %2839 = vmatprep.subr.bf16.mxu1 %v3558_v62 }
 0x3c9   :  { %2809 = vmatpush1.bf16.msra.mxu0 %v3496_v13  ;;  %2841 = vmatpush1.bf16.msra.mxu1 %v3563_v4 }
 0x3ca   :  { %2811 = vmatprep.subr.bf16.mxu0 %v3499_v14  ;;  %2843 = vmatprep.subr.bf16.mxu1 %v3566_v5 }
 0x3cd   :  { %2813 = vmatpush1.bf16.msra.mxu0 %v3503_v19  ;;  %2845 = vmatpush1.bf16.msra.mxu1 %v3571_v12 }
 0x3ce   :  { %2815 = vmatprep.subr.bf16.mxu0 %v3506_v20  ;;  %2847 = vmatprep.subr.bf16.mxu1 %v3574_v15 }
 0x3d1   :  { %2817 = vmatpush1.bf16.msra.mxu0 %v3514_v25  ;;  %2849 = vmatpush1.bf16.msra.mxu1 %v3579_v22 }
 0x3d2   :  { %2819 = vmatprep.subr.bf16.mxu0 %v3517_v26  ;;  %2851 = vmatprep.subr.bf16.mxu1 %v3582_v23 }
 0x3d5   :  { %2821 = vmatpush1.bf16.msra.mxu0 %v3521_v32  ;;  %2853 = vmatpush1.bf16.msra.mxu1 %v3587_v30 }
 0x3d6   :  { %2823 = vmatprep.subr.bf16.mxu0 %v3524_v35  ;;  %2855 = vmatprep.subr.bf16.mxu1 %v3590_v31 }
 0x3d9   :  { %2825 = vmatpush1.bf16.msra.mxu0 %v3529_v42  ;;  %2857 = vmatpush1.bf16.msra.mxu1 %v3595_v37 }
 0x3da   :  { %2859 = vmatprep.subr.bf16.mxu0 %v3456_v33  ;;  %2891 = vmatprep.subr.bf16.mxu1 %v3526_v38 }
 0x48f   :  { %v1355_v34 = vpop.f32.mrb[8].mxu0  ;;  %v1426_v36 = vpop.f32.mrb[12].mxu1 }
 0x490   :  { %v1357_v49 = vpop.f32.mrb[9].mxu0  ;;  %v1428_v50 = vpop.f32.mrb[13].mxu1 }
 0x491   :  { %v1435_v51 = vcombine.low %v1355_v34, %v1357_v49  ;;  %v1436_v52 = vcombine.low %v1426_v36, %v1428_v50 }
 0x493   :  { %v1443_v63 = vrot.slane %v1435_v51, %v3669_v27  ;;  %v1450_v53 = vrot.slane %v1436_v52, %v3669_v27 }
 0x495   :  { %v1451_v56 = vcombine.low %v1443_v63, %v1450_v53 }
 0x497   :  { %v1453_v40 = vadd.f32 %v1451_v56, %v1288_v57 }
 0x499   :  { %v2406_v59 = vmul.f32 -1.442695, %v1453_v40  ;;  %v1461_v61 = vrot.slane %v1453_v40, 2  ;;  %v1472_v44 = vrot.slane %v1453_v40, 6  ;;  %v1469_v11 = vrot.slane %v1453_v40, 4 }
 0x49b   :  { %3136 = vpow2.f32 %v2406_v59  ;;  %v2407_v43 = vmul.f32 -1.442695, %v1461_v61  ;;  %v2408_v1 = vmul.f32 -1.442695, %v1472_v44  ;;  %v1486_v59 = vld [vmem:[#allocation2 + $0x20] sm:$0xff] }
 0x49d   :  { %3138 = vpow2.f32 %v2407_v43 }
 0x49e   :  { %3140 = vpow2.f32 %v2408_v1 }
 0x4a5   :  { %v3137_v10 = vpop.eup %3136 }
 0x4a6   :  { %v1457_v16 = vadd.f32 1.0, %v3137_v10 }
 0x4a7   :  { %v3139_v18 = vpop.eup %3138 }
 0x4a8   :  { %3142 = vrcp.f32 %v1457_v16  ;;  %v1466_v17 = vadd.f32 1.0, %v3139_v18  ;;  %v3141_v21 = vpop.eup %3140 }
 0x4a9   :  { %3144 = vtanh.f32 %v1469_v11  ;;  %v1477_v2 = vadd.f32 1.0, %v3141_v21 }
 0x4aa   :  { %3146 = vrcp.f32 %v1466_v17 }
 0x4ab   :  { %3148 = vrcp.f32 %v1477_v2 }
 0x4b2   :  { %v3143_v8 = vpop.eup %3142 }
 0x4b3   :  { %v3145_v9 = vpop.eup %3144 }
 0x4b4   :  { %v3147_v39 = vpop.eup %3146  ;;  %v1481_v28 = vmul.f32 %v3145_v9, %v3143_v8 }
 0x4b5   :  { %v1480_v24 = vmul.f32 %v3147_v39, %v3753_v3  ;;  %v3149_v34 = vpop.eup %3148 }
 0x4b7   :  { %v3793_v29 = vadd.f32 %v1481_v28, %v1480_v24 }
 0x4b9   :  { %3150 = vtanh.f32 %v3793_v29 }
 0x4c3   :  { %v3151_v36 = vpop.eup %3150 }
 0x4c4   :  { %v1484_v49 = vmul.f32 %v3151_v36, %v3149_v34 }
 0x4c6   :  { %1552 = vmatmul.mubr.f32.vlgmr.msra.gmra.mrb[10].mxu0 %v1484_v49  ;;  %1623 = vmatmul.mubr.f32.vlgmr.msra.gmra.mrb[14].mxu1 %v1484_v49 }
 0x4c7   :  { %2861 = vmatpush1.bf16.msra.mxu0 %v3468_v46  ;;  %2893 = vmatpush1.bf16.msra.mxu1 %v3532_v45 }
 0x4c8   :  { %2863 = vmatprep.subr.bf16.mxu0 %v3470_v48  ;;  %2895 = vmatprep.subr.bf16.mxu1 %v3535_v47 }
 0x4c9   :  { %1749 = vmatprep.mubr.f32.mxu0 %v3342_v0  ;;  %1820 = vmatprep.mubr.f32.mxu1 %v3342_v0 }
 0x4cb   :  { %2865 = vmatpush1.bf16.msra.mxu0 %v3482_v58  ;;  %2897 = vmatpush1.bf16.msra.mxu1 %v3544_v54 }
 0x4cc   :  { %2867 = vmatprep.subr.bf16.mxu0 %v3485_v60  ;;  %2899 = vmatprep.subr.bf16.mxu1 %v3548_v55 }
 0x4cf   :  { %2869 = vmatpush1.bf16.msra.mxu0 %v3490_v6  ;;  %2901 = vmatpush1.bf16.msra.mxu1 %v3555_v41 }
 0x4d0   :  { %2871 = vmatprep.subr.bf16.mxu0 %v3493_v7  ;;  %2903 = vmatprep.subr.bf16.mxu1 %v3558_v62 }
 0x4d3   :  { %2873 = vmatpush1.bf16.msra.mxu0 %v3496_v13  ;;  %2905 = vmatpush1.bf16.msra.mxu1 %v3563_v4 }
 0x4d4   :  { %2875 = vmatprep.subr.bf16.mxu0 %v3499_v14  ;;  %2907 = vmatprep.subr.bf16.mxu1 %v3566_v5 }
 0x4d7   :  { %2877 = vmatpush1.bf16.msra.mxu0 %v3503_v19  ;;  %2909 = vmatpush1.bf16.msra.mxu1 %v3571_v12 }
 0x4d8   :  { %2879 = vmatprep.subr.bf16.mxu0 %v3506_v20  ;;  %2911 = vmatprep.subr.bf16.mxu1 %v3574_v15 }
 0x4db   :  { %2881 = vmatpush1.bf16.msra.mxu0 %v3514_v25  ;;  %2913 = vmatpush1.bf16.msra.mxu1 %v3579_v22 }
 0x4dc   :  { %2883 = vmatprep.subr.bf16.mxu0 %v3517_v26  ;;  %2915 = vmatprep.subr.bf16.mxu1 %v3582_v23 }
 0x4df   :  { %2885 = vmatpush1.bf16.msra.mxu0 %v3521_v32  ;;  %2917 = vmatpush1.bf16.msra.mxu1 %v3587_v30 }
 0x4e0   :  { %2887 = vmatprep.subr.bf16.mxu0 %v3524_v35  ;;  %2919 = vmatprep.subr.bf16.mxu1 %v3590_v31 }
 0x4e3   :  { %2889 = vmatpush1.bf16.msra.mxu0 %v3529_v42  ;;  %2921 = vmatpush1.bf16.msra.mxu1 %v3595_v37 }
 0x4e4   :  { %2923 = vmatprep.subr.bf16.mxu0 %v3456_v33  ;;  %2955 = vmatprep.subr.bf16.mxu1 %v3526_v38 }
 0x599   :  { %v1553_v3 = vpop.f32.mrb[10].mxu0  ;;  %v1624_v50 = vpop.f32.mrb[14].mxu1 }
 0x59a   :  { %v1555_v51 = vpop.f32.mrb[11].mxu0  ;;  %v1626_v52 = vpop.f32.mrb[15].mxu1 }
 0x59b   :  { %v1633_v63 = vcombine.low %v1553_v3, %v1555_v51  ;;  %v1634_v53 = vcombine.low %v1624_v50, %v1626_v52 }
 0x59d   :  { %v1641_v56 = vrot.slane %v1633_v63, %v3669_v27  ;;  %v1648_v57 = vrot.slane %v1634_v53, %v3669_v27 }
 0x59f   :  { %v1649_v40 = vcombine.low %v1641_v56, %v1648_v57 }
 0x5a1   :  { %v1651_v61 = vadd.f32 %v1649_v40, %v1486_v59 }
 0x5a3   :  { %v2409_v43 = vmul.f32 -1.442695, %v1651_v61  ;;  %v1659_v44 = vrot.slane %v1651_v61, 2  ;;  %v1670_v10 = vrot.slane %v1651_v61, 6  ;;  %v1667_v18 = vrot.slane %v1651_v61, 4 }
 0x5a5   :  { %3152 = vpow2.f32 %v2409_v43  ;;  %v2410_v1 = vmul.f32 -1.442695, %v1659_v44  ;;  %v2411_v11 = vmul.f32 -1.442695, %v1670_v10  ;;  %v1684_v43 = vld [vmem:[#allocation2 + $0x28] sm:$0xff] }
 0x5a7   :  { %3154 = vpow2.f32 %v2410_v1 }
 0x5a8   :  { %3156 = vpow2.f32 %v2411_v11 }
 0x5af   :  { %v3153_v16 = vpop.eup %3152 }
 0x5b0   :  { %v1655_v17 = vadd.f32 1.0, %v3153_v16 }
 0x5b1   :  { %v3155_v21 = vpop.eup %3154 }
 0x5b2   :  { %3158 = vrcp.f32 %v1655_v17  ;;  %v1664_v8 = vadd.f32 1.0, %v3155_v21  ;;  %v3157_v9 = vpop.eup %3156 }
 0x5b3   :  { %3160 = vtanh.f32 %v1667_v18  ;;  %v1675_v28 = vadd.f32 1.0, %v3157_v9 }
 0x5b4   :  { %3162 = vrcp.f32 %v1664_v8 }
 0x5b5   :  { %3164 = vrcp.f32 %v1675_v28 }
 0x5bc   :  { %v3159_v39 = vpop.eup %3158 }
 0x5bd   :  { %v3161_v2 = vpop.eup %3160 }
 0x5be   :  { %v3163_v24 = vpop.eup %3162  ;;  %v1679_v36 = vmul.f32 %v3161_v2, %v3159_v39 }
 0x5bf   :  { %v1678_v34 = vmul.f32 %v3163_v24, %v3793_v29  ;;  %v3165_v3 = vpop.eup %3164 }
 0x5c1   :  { %v3833_v49 = vadd.f32 %v1679_v36, %v1678_v34 }
 0x5c3   :  { %3166 = vtanh.f32 %v3833_v49 }
 0x5cd   :  { %v3167_v50 = vpop.eup %3166 }
 0x5ce   :  { %v1682_v51 = vmul.f32 %v3167_v50, %v3165_v3 }
 0x5d0   :  { %1750 = vmatmul.mubr.f32.vlgmr.msra.gmra.mrb[12].mxu0 %v1682_v51  ;;  %1821 = vmatmul.mubr.f32.vlgmr.msra.gmra.mrb[16].mxu1 %v1682_v51 }
 0x5d1   :  { %2925 = vmatpush1.bf16.msra.mxu0 %v3468_v46  ;;  %2957 = vmatpush1.bf16.msra.mxu1 %v3532_v45 }
 0x5d2   :  { %2927 = vmatprep.subr.bf16.mxu0 %v3470_v48  ;;  %2959 = vmatprep.subr.bf16.mxu1 %v3535_v47 }
 0x5d3   :  { %1947 = vmatprep.mubr.f32.mxu0 %v3342_v0  ;;  %2018 = vmatprep.mubr.f32.mxu1 %v3342_v0 }
 0x5d5   :  { %2929 = vmatpush1.bf16.msra.mxu0 %v3482_v58  ;;  %2961 = vmatpush1.bf16.msra.mxu1 %v3544_v54 }
 0x5d6   :  { %2931 = vmatprep.subr.bf16.mxu0 %v3485_v60  ;;  %2963 = vmatprep.subr.bf16.mxu1 %v3548_v55 }
 0x5d9   :  { %2933 = vmatpush1.bf16.msra.mxu0 %v3490_v6  ;;  %2965 = vmatpush1.bf16.msra.mxu1 %v3555_v41 }
 0x5da   :  { %2935 = vmatprep.subr.bf16.mxu0 %v3493_v7  ;;  %2967 = vmatprep.subr.bf16.mxu1 %v3558_v62 }
 0x5dd   :  { %2937 = vmatpush1.bf16.msra.mxu0 %v3496_v13  ;;  %2969 = vmatpush1.bf16.msra.mxu1 %v3563_v4 }
 0x5de   :  { %2939 = vmatprep.subr.bf16.mxu0 %v3499_v14  ;;  %2971 = vmatprep.subr.bf16.mxu1 %v3566_v5 }
 0x5e1   :  { %2941 = vmatpush1.bf16.msra.mxu0 %v3503_v19  ;;  %2973 = vmatpush1.bf16.msra.mxu1 %v3571_v12 }
 0x5e2   :  { %2943 = vmatprep.subr.bf16.mxu0 %v3506_v20  ;;  %2975 = vmatprep.subr.bf16.mxu1 %v3574_v15 }
 0x5e5   :  { %2945 = vmatpush1.bf16.msra.mxu0 %v3514_v25  ;;  %2977 = vmatpush1.bf16.msra.mxu1 %v3579_v22 }
 0x5e6   :  { %2947 = vmatprep.subr.bf16.mxu0 %v3517_v26  ;;  %2979 = vmatprep.subr.bf16.mxu1 %v3582_v23 }
 0x5e9   :  { %2949 = vmatpush1.bf16.msra.mxu0 %v3521_v32  ;;  %2981 = vmatpush1.bf16.msra.mxu1 %v3587_v30 }
 0x5ea   :  { %2951 = vmatprep.subr.bf16.mxu0 %v3524_v35  ;;  %2983 = vmatprep.subr.bf16.mxu1 %v3590_v31 }
 0x5ed   :  { %2953 = vmatpush1.bf16.msra.mxu0 %v3529_v42  ;;  %2985 = vmatpush1.bf16.msra.mxu1 %v3595_v37 }
 0x5ee   :  { %2987 = vmatprep.subr.bf16.mxu0 %v3456_v33  ;;  %3019 = vmatprep.subr.bf16.mxu1 %v3526_v38 }
 0x6a3   :  { %v1751_v29 = vpop.f32.mrb[12].mxu0  ;;  %v1822_v52 = vpop.f32.mrb[16].mxu1 }
 0x6a4   :  { %v1753_v63 = vpop.f32.mrb[13].mxu0  ;;  %v1824_v53 = vpop.f32.mrb[17].mxu1 }
 0x6a5   :  { %v1831_v56 = vcombine.low %v1751_v29, %v1753_v63  ;;  %v1832_v57 = vcombine.low %v1822_v52, %v1824_v53  ;;  %v2282_v63 = vld [vmem:[#allocation11] sm:$0xff]  ;;  %v2283_v53 = vld [vmem:[#allocation11 + $0x8] sm:$0xff] }
 0x6a7   :  { %v1839_v40 = vrot.slane %v1831_v56, %v3669_v27  ;;  %v1846_v59 = vrot.slane %v1832_v57, %v3669_v27  ;;  %v3051_v56 = vpack.c.bf16 %v2283_v53, %v2282_v63  ;;  %v3345_v57 = vmov 0.0|0.0  }
 0x6a9   :  { %v1847_v61 = vcombine.low %v1839_v40, %v1846_v59  ;;  %v2284_v40 = vld [vmem:[#allocation11 + $0x10] sm:$0xff]  ;;  %v2285_v59 = vld [vmem:[#allocation11 + $0x18] sm:$0xff] }
 0x6ab   :  { %v1849_v44 = vadd.f32 %v1847_v61, %v1684_v43  ;;  %v3054_v61 = vpack.c.bf16 %v2285_v59, %v2284_v40  ;;  %v2286_v43 = vld [vmem:[#allocation11 + $0x20] sm:$0xff] }
 0x6ad   :  { %v2412_v1 = vmul.f32 -1.442695, %v1849_v44  ;;  %v1857_v10 = vrot.slane %v1849_v44, 2  ;;  %v1868_v33 = vrot.slane %v1849_v44, 6  ;;  %v1865_v18 = vrot.slane %v1849_v44, 4  ;;  %v2287_v44 = vld [vmem:[#allocation11 + $0x28] sm:$0xff] }
 0x6af   :  { %3168 = vpow2.f32 %v2412_v1  ;;  %v2413_v11 = vmul.f32 -1.442695, %v1857_v10  ;;  %v2414_v38 = vmul.f32 -1.442695, %v1868_v33  ;;  %v3057_v1 = vpack.c.bf16 %v2287_v44, %v2286_v43  ;;  %v2288_v10 = vld [vmem:[#allocation11 + $0x30] sm:$0xff] }
 0x6b1   :  { %3170 = vpow2.f32 %v2413_v11  ;;  %v2289_v11 = vld [vmem:[#allocation11 + $0x38] sm:$0xff] }
 0x6b2   :  { %3172 = vpow2.f32 %v2414_v38  ;;  %v3060_v33 = vpack.c.bf16 %v2289_v11, %v2288_v10  ;;  %v2290_v38 = vld [vmem:[#allocation11 + $0x40] sm:$0xff] }
 0x6b9   :  { %v3169_v16 = vpop.eup %3168 }
 0x6ba   :  { %v1853_v17 = vadd.f32 1.0, %v3169_v16  ;;  %v2291_v16 = vld [vmem:[#allocation11 + $0x48] sm:$0xff] }
 0x6bb   :  { %v3171_v21 = vpop.eup %3170 }
 0x6bc   :  { %3174 = vrcp.f32 %v1853_v17  ;;  %v1862_v8 = vadd.f32 1.0, %v3171_v21  ;;  %v3173_v9 = vpop.eup %3172  ;;  %v2292_v17 = vld [vmem:[#allocation11 + $0x50] sm:$0xff]  ;;  %v2293_v21 = vld [vmem:[#allocation11 + $0x58] sm:$0xff] }
 0x6bd   :  { %3176 = vtanh.f32 %v1865_v18  ;;  %v1873_v28 = vadd.f32 1.0, %v3173_v9  ;;  %v3063_v18 = vpack.c.bf16 %v2291_v16, %v2290_v38  ;;  %v2294_v9 = vld [vmem:[#allocation11 + $0x60] sm:$0xff] }
 0x6be   :  { %3178 = vrcp.f32 %v1862_v8  ;;  %v3066_v8 = vpack.c.bf16 %v2293_v21, %v2292_v17 }
 0x6bf   :  { %3180 = vrcp.f32 %v1873_v28 }
 0x6c6   :  { %v3175_v39 = vpop.eup %3174 }
 0x6c7   :  { %v3177_v2 = vpop.eup %3176 }
 0x6c8   :  { %v3179_v24 = vpop.eup %3178  ;;  %v1877_v36 = vmul.f32 %v3177_v2, %v3175_v39  ;;  %v2296_v2 = vld [vmem:[#allocation11 + $0x70] sm:$0xff] }
 0x6c9   :  { %v1876_v34 = vmul.f32 %v3179_v24, %v3833_v49  ;;  %v3181_v50 = vpop.eup %3180  ;;  %v2297_v24 = vld [vmem:[#allocation11 + $0x78] sm:$0xff] }
 0x6ca   :  { %v3072_v28 = vpack.c.bf16 %v2297_v24, %v2296_v2 }
 0x6cb   :  { %v3873_v3 = vadd.f32 %v1877_v36, %v1876_v34 }
 0x6cd   :  { %3182 = vtanh.f32 %v3873_v3 }
 0x6d7   :  { %v3183_v51 = vpop.eup %3182 }
 0x6d8   :  { %v1880_v29 = vmul.f32 %v3183_v51, %v3181_v50 }
 0x6da   :  { %1948 = vmatmul.mubr.f32.vlgmr.msra.gmra.mrb[14].mxu0 %v1880_v29  ;;  %2019 = vmatmul.mubr.f32.vlgmr.msra.gmra.mrb[18].mxu1 %v1880_v29 }
 0x6db   :  { %2989 = vmatpush1.bf16.msra.mxu0 %v3468_v46  ;;  %3021 = vmatpush1.bf16.msra.mxu1 %v3532_v45 }
 0x6dc   :  { %2991 = vmatprep.subr.bf16.mxu0 %v3470_v48  ;;  %3023 = vmatprep.subr.bf16.mxu1 %v3535_v47 }
 0x6dd   :  { %2145 = vmatprep.mubr.f32.mxu0 %v3342_v0  ;;  %2216 = vmatprep.mubr.f32.mxu1 %v3342_v0 }
 0x6df   :  { %2993 = vmatpush1.bf16.msra.mxu0 %v3482_v58  ;;  %3025 = vmatpush1.bf16.msra.mxu1 %v3544_v54 }
 0x6e0   :  { %2995 = vmatprep.subr.bf16.mxu0 %v3485_v60  ;;  %3027 = vmatprep.subr.bf16.mxu1 %v3548_v55 }
 0x6e3   :  { %2997 = vmatpush1.bf16.msra.mxu0 %v3490_v6  ;;  %3029 = vmatpush1.bf16.msra.mxu1 %v3555_v41 }
 0x6e4   :  { %2999 = vmatprep.subr.bf16.mxu0 %v3493_v7  ;;  %3031 = vmatprep.subr.bf16.mxu1 %v3558_v62 }
 0x6e7   :  { %3001 = vmatpush1.bf16.msra.mxu0 %v3496_v13  ;;  %3033 = vmatpush1.bf16.msra.mxu1 %v3563_v4 }
 0x6e8   :  { %3003 = vmatprep.subr.bf16.mxu0 %v3499_v14  ;;  %3035 = vmatprep.subr.bf16.mxu1 %v3566_v5 }
 0x6eb   :  { %3005 = vmatpush1.bf16.msra.mxu0 %v3503_v19  ;;  %3037 = vmatpush1.bf16.msra.mxu1 %v3571_v12 }
 0x6ec   :  { %3007 = vmatprep.subr.bf16.mxu0 %v3506_v20  ;;  %3039 = vmatprep.subr.bf16.mxu1 %v3574_v15  ;;  %v1882_v20 = vld [vmem:[#allocation2 + $0x30] sm:$0xff] }
 0x6ef   :  { %3009 = vmatpush1.bf16.msra.mxu0 %v3514_v25  ;;  %3041 = vmatpush1.bf16.msra.mxu1 %v3579_v22 }
 0x6f0   :  { %3011 = vmatprep.subr.bf16.mxu0 %v3517_v26  ;;  %3043 = vmatprep.subr.bf16.mxu1 %v3582_v23 }
 0x6f3   :  { %3013 = vmatpush1.bf16.msra.mxu0 %v3521_v32  ;;  %3045 = vmatpush1.bf16.msra.mxu1 %v3587_v30 }
 0x6f4   :  { %3015 = vmatprep.subr.bf16.mxu0 %v3524_v35  ;;  %3047 = vmatprep.subr.bf16.mxu1 %v3590_v31 }
 0x6f7   :  { %3017 = vmatpush1.bf16.msra.mxu0 %v3529_v42  ;;  %3049 = vmatpush1.bf16.msra.mxu1 %v3595_v37 }
 0x6f8   :  { %3050 = vmatprep.subr.bf16.mxu0 %v3345_v57 }
 0x7ad   :  { %v1949_v46 = vpop.f32.mrb[14].mxu0  ;;  %v2020_v48 = vpop.f32.mrb[18].mxu1 }
 0x7ae   :  { %v1951_v58 = vpop.f32.mrb[15].mxu0  ;;  %v2022_v60 = vpop.f32.mrb[19].mxu1 }
 0x7af   :  { %v2029_v6 = vcombine.low %v1949_v46, %v1951_v58  ;;  %v2030_v7 = vcombine.low %v2020_v48, %v2022_v60  ;;  %v2080_v60 = vld [vmem:[#allocation2 + $0x38] sm:$0xff] }
 0x7b1   :  { %v2037_v13 = vrot.slane %v2029_v6, %v3669_v27  ;;  %v2044_v14 = vrot.slane %v2030_v7, %v3669_v27 }
 0x7b3   :  { %v2045_v19 = vcombine.low %v2037_v13, %v2044_v14 }
 0x7b5   :  { %v2047_v25 = vadd.f32 %v2045_v19, %v1882_v20 }
 0x7b7   :  { %v2415_v26 = vmul.f32 -1.442695, %v2047_v25  ;;  %v2055_v32 = vrot.slane %v2047_v25, 2  ;;  %v2066_v42 = vrot.slane %v2047_v25, 6  ;;  %v2063_v54 = vrot.slane %v2047_v25, 4 }
 0x7b9   :  { %3184 = vpow2.f32 %v2415_v26  ;;  %v2416_v35 = vmul.f32 -1.442695, %v2055_v32  ;;  %v2417_v45 = vmul.f32 -1.442695, %v2066_v42 }
 0x7bb   :  { %3186 = vpow2.f32 %v2416_v35 }
 0x7bc   :  { %3188 = vpow2.f32 %v2417_v45 }
 0x7c3   :  { %v3185_v47 = vpop.eup %3184 }
 0x7c4   :  { %v2051_v55 = vadd.f32 1.0, %v3185_v47 }
 0x7c5   :  { %v3187_v41 = vpop.eup %3186 }
 0x7c6   :  { %3190 = vrcp.f32 %v2051_v55  ;;  %v2060_v62 = vadd.f32 1.0, %v3187_v41  ;;  %v3189_v4 = vpop.eup %3188 }
 0x7c7   :  { %3192 = vtanh.f32 %v2063_v54  ;;  %v2071_v22 = vadd.f32 1.0, %v3189_v4 }
 0x7c8   :  { %3194 = vrcp.f32 %v2060_v62 }
 0x7c9   :  { %3196 = vrcp.f32 %v2071_v22  ;;  %v2421_v22 = vld [vmem:[%s3938_s5] ss:$0 sm:$0xff] }
 0x7d0   :  { %v3191_v5 = vpop.eup %3190 }
 0x7d1   :  { %v3193_v12 = vpop.eup %3192 }
 0x7d2   :  { %v3195_v15 = vpop.eup %3194  ;;  %v2075_v30 = vmul.f32 %v3193_v12, %v3191_v5 }
 0x7d3   :  { %v2074_v23 = vmul.f32 %v3195_v15, %v3873_v3  ;;  %v3197_v37 = vpop.eup %3196 }
 0x7d5   :  { %v3911_v31 = vadd.f32 %v2075_v30, %v2074_v23 }
 0x7d7   :  { %3198 = vtanh.f32 %v3911_v31 }
 0x7e1   :  { %v3199_v49 = vpop.eup %3198 }
 0x7e2   :  { %v2078_v52 = vmul.f32 %v3199_v49, %v3197_v37 }
 0x7e4   :  { %2146 = vmatmul.mubr.f32.vlgmr.msra.gmra.mrb[16].mxu0 %v2078_v52  ;;  %2217 = vmatmul.mubr.f32.vlgmr.msra.gmra.mrb[20].mxu1 %v2078_v52 }
 0x7e5   :  { %3052 = vmatpush3.bf16.msra.mxu0 %v3051_v56  ;;  %2471 = vmatprep.mubr.msk.f32.mxu0 %vm3346_vm2, %v3342_v0  ;;  %v2295_v0 = vld [vmem:[#allocation11 + $0x68] sm:$0xff] }
 0x7e6   :  { %3053 = vmatprep.subr.bf16.mxu0 %v3345_v57  ;;  %v3069_v39 = vpack.c.bf16 %v2295_v0, %v2294_v9 }
 0x7e9   :  { %3055 = vmatpush3.bf16.msra.mxu0 %v3054_v61 }
 0x7ea   :  { %3056 = vmatprep.subr.bf16.mxu0 %v3345_v57 }
 0x7ed   :  { %3058 = vmatpush3.bf16.msra.mxu0 %v3057_v1 }
 0x7ee   :  { %3059 = vmatprep.subr.bf16.mxu0 %v3345_v57 }
 0x7f1   :  { %3061 = vmatpush3.bf16.msra.mxu0 %v3060_v33 }
 0x7f2   :  { %3062 = vmatprep.subr.bf16.mxu0 %v3345_v57 }
 0x7f5   :  { %3064 = vmatpush3.bf16.msra.mxu0 %v3063_v18 }
 0x7f6   :  { %3065 = vmatprep.subr.bf16.mxu0 %v3345_v57 }
 0x7f9   :  { %3067 = vmatpush3.bf16.msra.mxu0 %v3066_v8 }
 0x7fa   :  { %3068 = vmatprep.subr.bf16.mxu0 %v3345_v57 }
 0x7fd   :  { %3070 = vmatpush3.bf16.msra.mxu0 %v3069_v39 }
 0x7fe   :  { %3071 = vmatprep.subr.bf16.mxu0 %v3345_v57 }
 0x801   :  { %3073 = vmatpush3.bf16.msra.mxu0 %v3072_v28 }
 0x8b7   :  { %v2147_v34 = vpop.f32.mrb[16].mxu0  ;;  %v2218_v36 = vpop.f32.mrb[20].mxu1 }
 0x8b8   :  { %v2149_v3 = vpop.f32.mrb[17].mxu0  ;;  %v2220_v50 = vpop.f32.mrb[21].mxu1 }
 0x8b9   :  { %v2227_v51 = vcombine.low %v2147_v34, %v2149_v3  ;;  %v2228_v29 = vcombine.low %v2218_v36, %v2220_v50 }
 0x8bb   :  { %v2235_v46 = vrot.slane %v2227_v51, %v3669_v27  ;;  %v2242_v48 = vrot.slane %v2228_v29, %v3669_v27 }
 0x8bd   :  { %v2243_v58 = vcombine.low %v2235_v46, %v2242_v48 }
 0x8bf   :  { %v2245_v6 = vadd.f32 %v2243_v58, %v2080_v60 }
 0x8c1   :  { %v2418_v7 = vmul.f32 -1.442695, %v2245_v6  ;;  %v2253_v13 = vrot.slane %v2245_v6, 2  ;;  %v2264_v19 = vrot.slane %v2245_v6, 6  ;;  %v2261_v26 = vrot.slane %v2245_v6, 4 }
 0x8c3   :  { %3200 = vpow2.f32 %v2418_v7  ;;  %v2419_v14 = vmul.f32 -1.442695, %v2253_v13  ;;  %v2420_v20 = vmul.f32 -1.442695, %v2264_v19 }
 0x8c5   :  { %3202 = vpow2.f32 %v2419_v14 }
 0x8c6   :  { %3204 = vpow2.f32 %v2420_v20 }
 0x8cd   :  { %v3201_v25 = vpop.eup %3200 }
 0x8ce   :  { %v2249_v32 = vadd.f32 1.0, %v3201_v25 }
 0x8cf   :  { %v3203_v35 = vpop.eup %3202 }
 0x8d0   :  { %3206 = vrcp.f32 %v2249_v32  ;;  %v2258_v42 = vadd.f32 1.0, %v3203_v35  ;;  %v3205_v27 = vpop.eup %3204 }
 0x8d1   :  { %3208 = vtanh.f32 %v2261_v26  ;;  %v2269_v55 = vadd.f32 1.0, %v3205_v27 }
 0x8d2   :  { %3210 = vrcp.f32 %v2258_v42 }
 0x8d3   :  { %3212 = vrcp.f32 %v2269_v55 }
 0x8da   :  { %v3207_v45 = vpop.eup %3206 }
 0x8db   :  { %v3209_v47 = vpop.eup %3208 }
 0x8dc   :  { %v3211_v54 = vpop.eup %3210  ;;  %v2273_v62 = vmul.f32 %v3209_v47, %v3207_v45 }
 0x8dd   :  { %v2272_v41 = vmul.f32 %v3211_v54, %v3911_v31  ;;  %v3213_v5 = vpop.eup %3212 }
 0x8df   :  { %v2274_v4 = vadd.f32 %v2273_v62, %v2272_v41 }
 0x8e1   :  { %3214 = vtanh.f32 %v2274_v4  ;;  %2278 = vst [vmem:[#allocation4] sm:$0x3] %v2274_v4 }
 0x8eb   :  { %v3215_v12 = vpop.eup %3214 }
 0x8ec   :  { %v2276_v15 = vmul.f32 %v3215_v12, %v3213_v5 }
 0x8ee   :  { %2277 = vst [vmem:[#allocation3] sm:$0x3] %v2276_v15  ;;  %2472 = vmatmul.mubr.f32.vlgmr.msra.gmra.mrb[18].mxu0 %v2276_v15 }
 0x9c1   :  { %v2371_v23 = vpop.f32.mrb[18].mxu0 }
 0x9c2   :  { %v2372_v30 = vadd.f32 %v2421_v22, %v2371_v23  ;;  %v2473_v37 = vpop.f32.mrb[19].mxu0 }
 0x9c4   :  { %2375 = vst [vmem:[#allocation13] sm:$0x3] %v2372_v30 }
 0x9c5   :  { %3315 = shalt.err (!%p3312_p8)
}
 0x9c6   :  { %s3316_s28 = scalar_lea.hbm %s3939_s6, 32 }
 0x9c7   :  { %p3317_p9 = scmp.ne.s32.totalorder %s3939_s6, %s3316_s28  ;;  %p3320_p10 = scmp.lt.u32.totalorder %s3316_s28, %s3939_s6 }
 0x9c9   :  { %p3322_p11 = pnand %p3320_p10, %p3317_p9 }
 0x9cb   :  { %3325 = shalt.err (!%p3322_p11)
}
 0x9cc   :  { %2385 = dma.vmem_to_hbm [thread:$0]  %s2383_s24, 32, %s3939_s6, [#allocation7]  }
 0x9cd   :  { %3332 = dma.done.wait [#allocation7], 32  }
 0x9ce   :  { %3333 = vsyncadd [#allocation7], 4294967264 }
 0x9cf   :  { %2389 = vsyncpa [#allocation6], 1 }
 0x9d0   :  { %2390 = vsyncpa [#allocation9], 1 }
 0x9d1   :  { %2391 = vsyncpa [#allocation12], 1 }
 0x9d2   :  { %2392 = vsyncpa [#allocation7], 1 }

</bundles_post_ra>
